<compile_context>
chip_gen: v7x
topology: tpu7x:2x2x1
jax: 0.10.0
libtpu: 0.0.40
codegen_flags: <defaults>
</compile_context>

<pallas_src>
import math
import functools

import jax
import jax.numpy as jnp
from jax import lax
from jax.experimental import pallas as pl
from jax.experimental.pallas import tpu as pltpu


def _round_up(x, m):
    return ((x + m - 1) // m) * m


_INV_SQRT2 = 1.0 / math.sqrt(2.0)
_SQRT_2_OVER_PI = math.sqrt(2.0 / math.pi)


def _gelu(x, approximate):
    if approximate:
        # tanh approximation -> EUP (transcendental) slot, leaves VALU free.
        inner = _SQRT_2_OVER_PI * (x + 0.044715 * (x * x * x))
        return 0.5 * x * (1.0 + jnp.tanh(inner))
    # torch.nn.functional.gelu default: x * 0.5 * (1 + erf(x / sqrt(2)))
    return 0.5 * x * (1.0 + lax.erf(x * _INV_SQRT2))


def _select_gelu_dtype(compute_dtype, approximate_gelu):
    """f32 for exact/torch parity; bf16 only for approx GELU on chips with bf16 VPU/EUP."""
    if not approximate_gelu or compute_dtype is None:
        return jnp.float32
    if jnp.dtype(compute_dtype) != jnp.dtype(jnp.bfloat16):
        return jnp.float32
    try:
        kind = jax.devices()[0].device_kind.lower()
    except Exception:
        return jnp.float32
    # v5e has no bf16 VPU/EUP path -> keep elementwise math in f32 there.
    if "v5 lite" in kind or "v5lite" in kind or "v5e" in kind:
        return jnp.float32
    return jnp.bfloat16


def _mlp_kernel(n_weights, approximate_gelu, gelu_dtype, *refs):
    # refs = (x_ref, w_0, ..., w_{n-1}, o_ref)
    x_ref = refs[0]
    w_refs = refs[1:1 + n_weights]
    o_ref = refs[1 + n_weights]

    h = x_ref[...]
    for i, w_ref in enumerate(w_refs):
        w = w_ref[...]
        if i > 0:
            h = _gelu(h.astype(gelu_dtype), approximate_gelu)
        # Operands in their (possibly bf16) native dtype -> fast MXU path;
        # accumulator stays f32 via preferred_element_type.
        h = jnp.dot(h.astype(w.dtype), w, preferred_element_type=jnp.float32)
    o_ref[...] = h.astype(o_ref.dtype)


def _pad_hidden_dims(weights, multiple=128):
    """Zero-pad intermediate (hidden) widths to lane-dense multiples of 128.

    Padded columns are zero, gelu(0)=0, and the next weight's padded rows are zero,
    so the result is unchanged. First input dim and final output dim are untouched.
    """
    ws = list(weights)
    for i in range(len(ws) - 1):
        h = int(ws[i].shape[1])
        h_pad = _round_up(h, multiple)
        if h_pad != h:
            ws[i] = jnp.pad(ws[i], ((0, 0), (0, h_pad - h)))
            ws[i + 1] = jnp.pad(ws[i + 1], ((0, h_pad - h), (0, 0)))
    return ws


def memory_mlp_forward(x, weights, *, tile_m=512, compute_dtype=None,
                       approximate_gelu=False):
    """MemoryMLP forward pass with a Pallas TPU kernel.

    x:             [..., dim]
    weights:       list of [dim_in, dim_out] arrays (chained dims).
    compute_dtype: optional matmul-operand dtype (e.g. jnp.bfloat16 for MXU fast path).
    approximate_gelu: use tanh-approximate GELU (EUP) instead of exact erf.
    """
    orig_shape = x.shape
    dim = int(orig_shape[-1])
    M = int(math.prod(orig_shape[:-1])) if len(orig_shape) > 1 else 1
    x2 = x.reshape(M, dim)

    out_dtype = x.dtype
    ws = list(weights)
    if compute_dtype is not None:
        x2 = x2.astype(compute_dtype)
        ws = [w.astype(compute_dtype) for w in ws]

    # Lane-dense hidden widths (no-op when already multiples of 128).
    ws = _pad_hidden_dims(ws)
    dim_out = int(ws[-1].shape[1])

    gelu_dtype = _select_gelu_dtype(compute_dtype, approximate_gelu)

    # --- M tiling: MXU-aligned, no bigger than M, and (when affordable) small enough
    #     that the grid has >= 4 steps (>= 2 per v7x TensorCore) for pipelining. ---
    tile_m = max(8, _round_up(int(tile_m), 8))
    tile_m = min(tile_m, _round_up(M, 8))
    min_steps = 4
    if M >= min_steps * 64:
        tile_m = min(tile_m, max(64, _round_up(pl.cdiv(M, min_steps), 8)))
    grid_m = pl.cdiv(M, tile_m)   # ragged last block allowed; stores are masked.

    n_w = len(ws)
    kernel = functools.partial(_mlp_kernel, n_w, approximate_gelu, gelu_dtype)

    # Weights: fully VMEM-resident, constant index_map (never re-fetched between steps).
    # For MiB-scale weight sets single-buffer them (double-buffering is pure VMEM waste).
    w_bytes = sum(int(w.size) * w.dtype.itemsize for w in ws)
    single_buffer_weights = w_bytes > (4 << 20)

    in_specs = [pl.BlockSpec((tile_m, dim), lambda i: (i, 0))]
    for w in ws:
        if single_buffer_weights:
            in_specs.append(pl.BlockSpec(w.shape, lambda i: (0, 0),
                                         pipeline_mode=pl.Buffered(1)))
        else:
            in_specs.append(pl.BlockSpec(w.shape, lambda i: (0, 0)))
    out_specs = pl.BlockSpec((tile_m, dim_out), lambda i: (i, 0))

    # --- cost estimate (advisory, helps XLA schedule around the custom call) ---
    flops = 2 * M * sum(int(w.shape[0]) * int(w.shape[1]) for w in ws)
    transcendentals = M * sum(int(w.shape[0]) for w in ws[1:])
    bytes_accessed = int(x2.size * x2.dtype.itemsize + w_bytes
                         + M * dim_out * jnp.dtype(out_dtype).itemsize)

    # --- VMEM budget: need + slack, capped at 48 MiB (safe on v7x's 64 MiB) ---
    widths = [dim] + [int(w.shape[1]) for w in ws]
    h_bytes = tile_m * max(widths) * 4                      # live f32 accumulator
    x_tile_bytes = tile_m * dim * x2.dtype.itemsize
    o_tile_bytes = tile_m * dim_out * jnp.dtype(out_dtype).itemsize
    w_buf = 1 if single_buffer_weights else 2
    vmem_needed = (2 * (x_tile_bytes + o_tile_bytes) + w_buf * w_bytes
                   + 2 * h_bytes + (2 << 20))
    vmem_limit = int(min(vmem_needed, 48 << 20))

    out = pl.pallas_call(
        kernel,
        out_shape=jax.ShapeDtypeStruct((M, dim_out), out_dtype),
        grid=(grid_m,),
        in_specs=in_specs,
        out_specs=out_specs,
        compiler_params=pltpu.CompilerParams(
            dimension_semantics=("parallel",),
            vmem_limit_bytes=vmem_limit),
        cost_estimate=pl.CostEstimate(
            flops=int(flops),
            transcendentals=int(transcendentals),
            bytes_accessed=bytes_accessed),
    )(x2, *ws)

    return out.reshape(orig_shape[:-1] + (dim_out,))


def init_memory_mlp_weights(key, dim, depth, expansion_factor=2.0):
    """Deterministic re-implementation of MemoryMLP.__init__ parameter init."""
    dim_hidden = int(dim * expansion_factor)
    if depth == 1:
        dims_list = [dim, dim]
    elif depth > 1:
        dims_list = [dim] + [dim_hidden] * (depth - 1) + [dim]
    else:
        raise ValueError("Depth must be at least 1")

    weights = []
    for dim_in, dim_out in zip(dims_list[:-1], dims_list[1:]):
        key, sub = jax.random.split(key)
        if dim_in == dim_out:
            w = jnp.eye(dim_in, dtype=jnp.float32)                 # nn.init.eye_
        else:
            a = math.sqrt(6.0 / (dim_in + dim_out))                # xavier_uniform_
            w = jax.random.uniform(sub, (dim_in, dim_out),
                                   dtype=jnp.float32, minval=-a, maxval=a)
        weights.append(w)
    return weights


def memory_mlp_reference(x, weights, *, compute_dtype=None,
                         approximate_gelu=False, gelu_dtype=jnp.float32):
    """Pure-JAX reference mirroring the kernel's cast points."""
    h = x
    ws = list(weights)
    if compute_dtype is not None:
        h = h.astype(compute_dtype)
        ws = [w.astype(compute_dtype) for w in ws]
    for i, w in enumerate(ws):
        if i > 0:
            h = _gelu(h.astype(gelu_dtype), approximate_gelu)
        h = jnp.dot(h.astype(w.dtype), w, preferred_element_type=jnp.float32)
    return h.astype(x.dtype)


if __name__ == "__main__":
    key = jax.random.PRNGKey(0)
    k_x, k_w, k_x2 = jax.random.split(key, 3)

    # dim=128 keeps loads/stores lane-dense (full vreg lanes / MXU output columns).
    batch, seq, dim = 2, 256, 128
    depth = 3                    # dims [128, 256, 256, 128]: exercises eye + xavier init
    expansion_factor = 2.0

    weights = init_memory_mlp_weights(k_w, dim, depth, expansion_factor)
    x = jax.random.normal(k_x, (batch, seq, dim), dtype=jnp.float32)

    # 1) Exact f32 path (strict torch parity: f32 MXU operands, erf GELU).
    out = jax.block_until_ready(memory_mlp_forward(x, weights))
    ref = memory_mlp_reference(x, weights)
    assert out.shape == x.shape
    assert jnp.allclose(out, ref, atol=1e-4, rtol=1e-4), "mismatch vs f32 reference"

    # 2) bf16 MXU fast path + tanh-approx GELU (looser parity, compared against a
    #    reference that mirrors the same cast points).
    gelu_dt = _select_gelu_dtype(jnp.bfloat16, True)
    out_bf = jax.block_until_ready(
        memory_mlp_forward(x, weights, compute_dtype=jnp.bfloat16,
                           approximate_gelu=True))
    ref_bf = memory_mlp_reference(x, weights, compute_dtype=jnp.bfloat16,
                                  approximate_gelu=True, gelu_dtype=gelu_dt)
    assert out_bf.shape == x.shape
    assert jnp.allclose(out_bf.astype(jnp.float32), ref_bf.astype(jnp.float32),
                        atol=2e-2, rtol=2e-2), "mismatch vs bf16 reference"

    # 3) M not divisible by tile_m: exercises the ragged last block (no pad/slice).
    x_odd = jax.random.normal(k_x2, (2, 300, dim), dtype=jnp.float32)   # M = 600
    out_odd = jax.block_until_ready(memory_mlp_forward(x_odd, weights))
    ref_odd = memory_mlp_reference(x_odd, weights)
    assert out_odd.shape == x_odd.shape
    assert jnp.allclose(out_odd, ref_odd, atol=1e-4, rtol=1e-4), "mismatch (ragged M)"

    print("KERNEL_OK")
</pallas_src>

<mosaic_0001>
module attributes {stable_mosaic.version = 11 : i64} {
  func.func @_mlp_kernel(%arg0: i32, %arg1: memref<128x128xf32, #tpu.memory_space<vmem>>, %arg2: memref<128x256xf32, #tpu.memory_space<vmem>>, %arg3: memref<256x256xf32, #tpu.memory_space<vmem>>, %arg4: memref<256x128xf32, #tpu.memory_space<vmem>>, %arg5: memref<128x128xf32, #tpu.memory_space<vmem>>) attributes {dimension_semantics = [#tpu.dimension_semantics<parallel>], iteration_bounds = array<i64: 4>, scalar_prefetch = 0 : i64, scratch_operands = 0 : i64, tpu.core_type = #tpu.core_type<tc>, window_params = [{transform_indices = @transform_0, window_bounds = array<i64: 128, 128>}, {pipeline_mode = #tpu.pipeline_mode<synchronous>, transform_indices = @transform_1, window_bounds = array<i64: 128, 256>}, {pipeline_mode = #tpu.pipeline_mode<synchronous>, transform_indices = @transform_2, window_bounds = array<i64: 256, 256>}, {pipeline_mode = #tpu.pipeline_mode<synchronous>, transform_indices = @transform_3, window_bounds = array<i64: 256, 128>}, {transform_indices = @transform_4, window_bounds = array<i64: 128, 128>}]} {
    %c0 = arith.constant 0 : index
    %c0_0 = arith.constant 0 : index
    %0 = vector.load %arg1[%c0, %c0_0] : memref<128x128xf32, #tpu.memory_space<vmem>>, vector<128x128xf32>
    %c0_1 = arith.constant 0 : index
    %c0_2 = arith.constant 0 : index
    %1 = vector.load %arg2[%c0_1, %c0_2] : memref<128x256xf32, #tpu.memory_space<vmem>>, vector<128x256xf32>
    %cst = arith.constant dense<0.000000e+00> : vector<128x256xf32>
    %2 = tpu.matmul %0, %1, %cst {dimension_numbers = #tpu.dot_dimension_numbers<[1], [0], [0], [1], [0, 0, 1, 1], [], []>} : vector<128x128xf32>, vector<128x256xf32>, vector<128x256xf32> -> vector<128x256xf32>
    %c0_3 = arith.constant 0 : index
    %c0_4 = arith.constant 0 : index
    %3 = vector.load %arg3[%c0_3, %c0_4] : memref<256x256xf32, #tpu.memory_space<vmem>>, vector<256x256xf32>
    %cst_5 = arith.constant 5.000000e-01 : f32
    %4 = vector.broadcast %cst_5 : f32 to vector<128x256xf32>
    %5 = arith.mulf %4, %2 : vector<128x256xf32>
    %cst_6 = arith.constant 0.707106769 : f32
    %6 = vector.broadcast %cst_6 : f32 to vector<128x256xf32>
    %7 = arith.mulf %2, %6 : vector<128x256xf32>
    %8 = math.erf %7 : vector<128x256xf32>
    %cst_7 = arith.constant 1.000000e+00 : f32
    %9 = vector.broadcast %cst_7 : f32 to vector<128x256xf32>
    %10 = arith.addf %9, %8 : vector<128x256xf32>
    %11 = arith.mulf %5, %10 : vector<128x256xf32>
    %cst_8 = arith.constant dense<0.000000e+00> : vector<128x256xf32>
    %12 = tpu.matmul %11, %3, %cst_8 {dimension_numbers = #tpu.dot_dimension_numbers<[1], [0], [0], [1], [0, 0, 1, 1], [], []>} : vector<128x256xf32>, vector<256x256xf32>, vector<128x256xf32> -> vector<128x256xf32>
    %c0_9 = arith.constant 0 : index
    %c0_10 = arith.constant 0 : index
    %13 = vector.load %arg4[%c0_9, %c0_10] : memref<256x128xf32, #tpu.memory_space<vmem>>, vector<256x128xf32>
    %cst_11 = arith.constant 5.000000e-01 : f32
    %14 = vector.broadcast %cst_11 : f32 to vector<128x256xf32>
    %15 = arith.mulf %14, %12 : vector<128x256xf32>
    %cst_12 = arith.constant 0.707106769 : f32
    %16 = vector.broadcast %cst_12 : f32 to vector<128x256xf32>
    %17 = arith.mulf %12, %16 : vector<128x256xf32>
    %18 = math.erf %17 : vector<128x256xf32>
    %cst_13 = arith.constant 1.000000e+00 : f32
    %19 = vector.broadcast %cst_13 : f32 to vector<128x256xf32>
    %20 = arith.addf %19, %18 : vector<128x256xf32>
    %21 = arith.mulf %15, %20 : vector<128x256xf32>
    %cst_14 = arith.constant dense<0.000000e+00> : vector<128x128xf32>
    %22 = tpu.matmul %21, %13, %cst_14 {dimension_numbers = #tpu.dot_dimension_numbers<[1], [0], [0], [1], [0, 0, 1, 1], [], []>} : vector<128x256xf32>, vector<256x128xf32>, vector<128x128xf32> -> vector<128x128xf32>
    %c0_15 = arith.constant 0 : index
    %c0_16 = arith.constant 0 : index
    %23 = vector.load %arg5[%c0_15, %c0_16] : memref<128x128xf32, #tpu.memory_space<vmem>>, vector<128x128xf32>
    tpu.vector_store %arg5[%c0_15, %c0_16], %22 {strides = array<i32>} : memref<128x128xf32, #tpu.memory_space<vmem>>, vector<128x128xf32>,
    return
  }
  func.func @transform_0(%arg0: i32) -> (i32, i32) {
    %c0_i32 = arith.constant 0 : i32
    %c0_i32_0 = arith.constant 0 : i32
    return %arg0, %c0_i32 : i32, i32
  }
  func.func @transform_1(%arg0: i32) -> (i32, i32) {
    %c0_i32 = arith.constant 0 : i32
    %c0_i32_0 = arith.constant 0 : i32
    %c0_i32_1 = arith.constant 0 : i32
    return %c0_i32, %c0_i32_0 : i32, i32
  }
  func.func @transform_2(%arg0: i32) -> (i32, i32) {
    %c0_i32 = arith.constant 0 : i32
    %c0_i32_0 = arith.constant 0 : i32
    %c0_i32_1 = arith.constant 0 : i32
    return %c0_i32, %c0_i32_0 : i32, i32
  }
  func.func @transform_3(%arg0: i32) -> (i32, i32) {
    %c0_i32 = arith.constant 0 : i32
    %c0_i32_0 = arith.constant 0 : i32
    %c0_i32_1 = arith.constant 0 : i32
    return %c0_i32, %c0_i32_0 : i32, i32
  }
  func.func @transform_4(%arg0: i32) -> (i32, i32) {
    %c0_i32 = arith.constant 0 : i32
    %c0_i32_0 = arith.constant 0 : i32
    return %arg0, %c0_i32 : i32, i32
  }
}

</mosaic_0001>

<bundles_post_ra>
// kernel: tpu_custom_call.1
= control target key start
LH: loop header
LB: loop body
LE: loop exit
PB: predicated region body
PF: predicated region fallthrough
CT: control target
= control target key end

     0   :  { %9 = vsyncpa [#allocation3], 0  ;;  %s2374_s0 = inlined_call_operand.hbm [shape: f32[512,128], index: 0, kind: input, shape index: {}]   ;;  %s2375_s1 = inlined_call_operand.hbm [shape: f32[128,256], index: 1, kind: input, shape index: {}]   ;;  %s2376_s2 = inlined_call_operand.hbm [shape: f32[256,256], index: 2, kind: input, shape index: {}]   ;;  %s2377_s3 = inlined_call_operand.hbm [shape: f32[256,128], index: 3, kind: input, shape index: {}]   ;;  %s2378_s4 = inlined_call_operand.hbm [shape: f32[512,128], index: 4, kind: output, shape index: {}]  }
   0x1   :  { %11 = vsyncpa [#allocation3 + $0x1], 0 }
   0x2   :  { %12 = vsyncpa [#allocation6], 0 }
   0x3   :  { %13 = vsyncpa [#allocation9], 0 }
   0x4   :  { %14 = vsyncpa [#allocation4], 0 }
   0x5   :  { %16 = vsyncpa [#allocation4 + $0x1], 0  ;;  %s2010_s15 = smov 0   ;;  %s2012_s16 = smov 0  }
   0x6   :  { %s2014_s17 = smov 0   ;;  %s2016_s18 = smov 0  }
   0x7 LB: > { %s2031_s19 = sadd.s32 4294967295, %s1971_s18   ;;  %s1325_s20 = sadd.s32 4294967294, %s1971_s18   ;;  %s1971_s18 = sphi %s2016_s18, %s2400_s18   ;;  %s1967_s17 = sphi %s2014_s17, %s2399_s17   ;;  %s1963_s16 = sphi %s2012_s16, %s2398_s16   ;;  %s1959_s15 = sphi %s2010_s15, %s2397_s15  }
   0x8   : > { %p42_p0 = scmp.ne.s32.totalorder %s1963_s16, %s1959_s15  ;;  %p2379_p1 = scmp.eq.s32.totalorder %s2031_s19, 0 }
   0x9   : > { %p135_p3 = scmp.eq.s32.totalorder %s1325_s20, 3  ;;  %p1326_p5 = scmp.ge.s32.totalorder %s1971_s18, 1 }
   0xa   : > { %p2040_p4 = por %p2379_p1, %p42_p0  ;;  %p142_p7 = scmp.lt.s32.totalorder %s1971_s18, 5 }
   0xb   : > { %p2045_p6 = por %p135_p3, %p42_p0  ;;  %s1973_s24 = smov [#allocation5]  }
   0xc   : > { %s2382_s21 = scalar_select %p2040_p4, 1, 0 }
   0xd   : > { %s2383_s22 = scalar_select %p2045_p6, 1, 0 }
   0xe   : > { %p2050_p8 = pnand %p1326_p5, %p142_p7  ;;  %s154_s25 = sshll.u32 %s1973_s24, 4  ;;  %s2054_s25 = int_to_ptr.vmem [resolvable:$true] %s154_s25 }
   0xf   : > { %s1974_s27 = smov [#allocation7]   ;;  %s1975_s29 = smov [#allocation8]  }
  0x10   : > { %s2384_s23 = scalar_select %p2050_p8, 1, 0 }
  0x11   : > { %p1587_p9 = pneg %p2050_p8  ;;  %s167_s28 = sshll.u32 %s1974_s27, 4  ;;  %s2064_s28 = int_to_ptr.vmem [resolvable:$true] %s167_s28 }
  0x12   : > { %s2066_s30 = sshll.u32 %s1975_s29, 4  ;;  %s1783_s7 = scalar_lea.hbm %s2375_s1, 4096  ;;  %s181_s30 = int_to_ptr.vmem [resolvable:$true] %s2066_s30 }
  0x13   : > { %p2060_p10 = pnand %p1587_p9, %p2379_p1  ;;  %p1784_p11 = scmp.ne.s32.totalorder %s2375_s1, %s1783_s7 }
  0x14   : > { %p1790_p3 = scmp.lt.u32.totalorder %s1783_s7, %s2375_s1 }
  0x15   : > { %p2076_p12 = pneg %p2060_p10 }
  0x17   : > { %p1786_p13 = pnand %p2076_p12, %p1784_p11 }
  0x19   : > { %p1787_p0 = pneg %p1786_p13 }
  0x1b   : > { %p1792_p5 = pnand %p1790_p3, %p1787_p0 }
  0x1d   : > { %1795 = shalt.err (!%p1792_p5)
}
  0x1e   : > { %s1796_s13 = scalar_lea.vmem %s2054_s25, 4096  ;;  %p1804_p2 = scmp.lt.s32.totalorder %s2054_s25, %s2054_s25 }
  0x1f   : > { %p1797_p7 = scmp.ne.s32.totalorder %s2054_s25, %s1796_s13  ;;  %p1805_p6 = scmp.lt.s32.totalorder %s1796_s13, %s1796_s13 }
  0x21   : > { %p1799_p9 = pnand %p1797_p7, %p2076_p12  ;;  %p1806_p11 = por %p1805_p6, %p1804_p2 }
  0x23   : > { %p1800_p1 = pneg %p1799_p9 }
  0x25   : > { %p1807_p13 = pnand %p1806_p11, %p1800_p1 }
  0x27   : > { %1810 = shalt.err (!%p1807_p13)
}
  0x28   : > { %s1976_s14 = smov 256   ;;  %s1977_s20 = smov 16  }
  0x29   : > { %1590 = dma.hbm_to_vmem [thread:$0]  (!%p2060_p10), %s2375_s1, 4096, %s2054_s25, [#allocation6], %s1976_s14, %s1976_s14, %s1977_s20  }
  0x2a   : > { %s1811_s6 = scalar_lea.hbm %s2376_s2, 8192 }
  0x2b   : > { %p1812_p2 = scmp.ne.s32.totalorder %s2376_s2, %s1811_s6  ;;  %p1818_p0 = scmp.lt.u32.totalorder %s1811_s6, %s2376_s2 }
  0x2d   : > { %p1814_p1 = pnand %p1812_p2, %p2076_p12 }
  0x2f   : > { %p1815_p6 = pneg %p1814_p1 }
  0x31   : > { %p1820_p3 = pnand %p1818_p0, %p1815_p6 }
  0x33   : > { %1823 = shalt.err (!%p1820_p3)
}
  0x34   : > { %s1824_s25 = scalar_lea.vmem %s2064_s28, 8192  ;;  %p1832_p11 = scmp.lt.s32.totalorder %s2064_s28, %s2064_s28 }
  0x35   : > { %p1825_p5 = scmp.ne.s32.totalorder %s2064_s28, %s1824_s25  ;;  %p1833_p13 = scmp.lt.s32.totalorder %s1824_s25, %s1824_s25 }
  0x37   : > { %p1827_p7 = pnand %p1825_p5, %p2076_p12  ;;  %p1834_p2 = por %p1833_p13, %p1832_p11 }
  0x39   : > { %p1828_p9 = pneg %p1827_p7 }
  0x3b   : > { %p1835_p1 = pnand %p1834_p2, %p1828_p9 }
  0x3d   : > { %1838 = shalt.err (!%p1835_p1)
}
  0x3e   : > { %1593 = dma.hbm_to_vmem [thread:$0]  (!%p2060_p10), %s2376_s2, 8192, %s2064_s28, [#allocation6], %s1976_s14, %s1976_s14, %s1977_s20  }
  0x3f   : > { %s1839_s29 = scalar_lea.hbm %s2377_s3, 4096 }
  0x40   : > { %p1840_p6 = scmp.ne.s32.totalorder %s2377_s3, %s1839_s29  ;;  %p1846_p5 = scmp.lt.u32.totalorder %s1839_s29, %s2377_s3 }
  0x42   : > { %p1842_p0 = pnand %p1840_p6, %p2076_p12 }
  0x44   : > { %p1843_p3 = pneg %p1842_p0 }
  0x46   : > { %p1848_p7 = pnand %p1846_p5, %p1843_p3 }
  0x48   : > { %1851 = shalt.err (!%p1848_p7)
}
  0x49   : > { %s1852_s9 = scalar_lea.vmem %s181_s30, 4096  ;;  %p1860_p2 = scmp.lt.s32.totalorder %s181_s30, %s181_s30 }
  0x4a   : > { %p1853_p9 = scmp.ne.s32.totalorder %s181_s30, %s1852_s9  ;;  %p1861_p1 = scmp.lt.s32.totalorder %s1852_s9, %s1852_s9 }
  0x4c   : > { %p1855_p11 = pnand %p1853_p9, %p2076_p12  ;;  %p1862_p4 = por %p1861_p1, %p1860_p2 }
  0x4e   : > { %p1856_p13 = pneg %p1855_p11 }
  0x50   : > { %p1863_p8 = pnand %p1862_p4, %p1856_p13 }
  0x52   : > { %1866 = shalt.err (!%p1863_p8)
}
  0x53   : > { %s1978_s28 = smov 128   ;;  %s1979_s10 = smov 8  }
  0x54   : > { %1596 = dma.hbm_to_vmem [thread:$0]  (!%p2060_p10), %s2377_s3, 4096, %s181_s30, [#allocation9], %s1978_s28, %s1978_s28, %s1979_s10  }
  0x55   : > { %s2143_s11 = sadd.s32 1, %s1971_s18   ;;  %s29_s12 = sadd.s32 1, %s1967_s17 }
  0x56   : > { %s26_s25 = ssub.s32 %s1971_s18, %s2143_s11  ;;  %p36_p8 = scmp.ne.s32.totalorder %s1967_s17, %s1963_s16 }
  0x57   : > { %p27_p4 = scmp.eq.s32.totalorder %s26_s25, 0  ;;  %p37_p12 = scmp.eq.s32.totalorder %s1971_s18, 0 }
  0x58   : > { %p1608_p6 = scmp.lt.s32.totalorder %s1971_s18, 4  ;;  %p2387_p3 = scmp.eq.s32.totalorder %s2031_s19, 3 }
  0x59   : > { %s2153_s13 = scalar_select %p27_p4, %s1967_s17, %s29_s12  }
  0x5a   : > { %p38_p0 = por %p37_p12, %p36_p8  ;;  %p2157_p5 = por %p2387_p3, %p36_p8 }
  0x5b   : > { %s194_s24 = sand.u32 1, %s1967_s17   ;;  %s1345_s27 = sshll.u32 %s1971_s18, 11 }
  0x5c   : > { %s1331_s30 = sshll.u32 %s194_s24, 7  ;;  %s2166_s6 = scalar_lea.hbm %s2374_s0, %s1345_s27 }
  0x5d   : > { %s198_s7 = scalar_lea.vmem [#allocation2], %s1331_s30  ;;  %p2168_p10 = pnand %p1608_p6, %p38_p0 }
  0x5e   : > { %s205_s8 = sshll.u32 %s198_s7, 4  ;;  %s2174_s14 = scalar_lea.sflag [#allocation3], %s194_s24  ;;  %s2172_s8 = int_to_ptr.vmem [resolvable:$true] %s205_s8 }
  0x5f   : > { %s1867_s20 = scalar_lea.hbm %s2166_s6, 2048  ;;  %p1869_p9 = pneg %p2168_p10 }
  0x60   : > { %p1868_p7 = scmp.ne.s32.totalorder %s2166_s6, %s1867_s20  ;;  %s1872_s27 = scalar_lea.hbm %s2374_s0, 8192 }
  0x61   : > { %p1873_p2 = scmp.lt.u32.totalorder %s2166_s6, %s2374_s0  ;;  %p1874_p1 = scmp.lt.u32.totalorder %s1872_s27, %s1867_s20 }
  0x62   : > { %p1870_p11 = pnand %p1869_p9, %p1868_p7  ;;  %p1876_p8 = scmp.lt.u32.totalorder %s1867_s20, %s2166_s6 }
  0x63   : > { %p1875_p4 = por %p1874_p1, %p1873_p2 }
  0x64   : > { %p1871_p13 = pneg %p1870_p11 }
  0x65   : > { %p1877_p12 = por %p1876_p8, %p1875_p4 }
  0x67   : > { %p1878_p6 = pnand %p1877_p12, %p1871_p13 }
  0x69   : > { %1881 = shalt.err (!%p1878_p6)
}
  0x6a   : > { %s1882_s24 = scalar_lea.vmem %s2172_s8, 2048  ;;  %s1980_s5 = smov [#allocation2]  }
  0x6b   : > { %p1883_p0 = scmp.ne.s32.totalorder %s2172_s8, %s1882_s24  ;;  %s1887_s7 = sshll.u32 %s1980_s5, 4  ;;  %s1888_s7 = int_to_ptr.vmem [resolvable:$false] %s1887_s7 }
  0x6c   : > { %s1889_s25 = scalar_lea.vmem %s1888_s7, 4096  ;;  %p1890_p11 = scmp.lt.s32.totalorder %s2172_s8, %s1888_s7 }
  0x6d   : > { %p1885_p3 = pnand %p1883_p0, %p1869_p9  ;;  %p1891_p2 = scmp.lt.s32.totalorder %s1889_s25, %s1882_s24 }
  0x6f   : > { %p1886_p7 = pneg %p1885_p3  ;;  %p1892_p1 = por %p1891_p2, %p1890_p11 }
  0x71   : > { %p1893_p4 = pnand %p1892_p1, %p1886_p7 }
  0x73   : > { %1896 = shalt.err (!%p1893_p4)
}
  0x74   : > { %1600 = dma.hbm_to_vmem [thread:$0]  (!%p2168_p10), %s2166_s6, 2048, %s2172_s8, %s2174_s14, %s1978_s28, %s1978_s28, %s1979_s10  }
  0x75   : > { %p2390_p9 = scmp.ne.s32.totalorder %s2384_s23, 0 }
  0x76   : > { %s2208_s20 = sand.u32 (!%p2390_p9), 1, %s1963_s16   ;;  %p2391_p13 = scmp.ne.s32.totalorder (!%p2390_p9), %s2382_s21, 0 }
  0x77   : > { %217 = sbr.rel (%p2390_p9) target bundleno = 921 (0x399), region = 36  ;;  %s1335_s12 = sshll.u32 (!%p2390_p9), %s2208_s20, 7 }
  0x78   : > { %s220_s27 = scalar_lea.sflag (!%p2390_p9), [#allocation3], %s2208_s20  ;;  %s2214_s9 = scalar_lea.vmem (!%p2390_p9), [#allocation2], %s1335_s12 }
  0x7e   : > { %1942 = dma.done.wait (%p2391_p13), %s220_s27, 2048  }
  0x7f   : > { %1944 = vsyncadd (%p2391_p13), %s220_s27, 4294965248  ;;  %p2392_p10 = scmp.eq.s32.totalorder %s2031_s19, 0 }
  0x81   : > { %1946 = dma.done.wait (%p2392_p10), [#allocation6], 12288   ;;  %p2393_p8 = pmov %p2392_p10 }
  0x83   : > { %1948 = vsyncadd (%p2393_p8), [#allocation6], 4294955008  ;;  %p2394_p12 = pmov %p2393_p8 }
  0x84   : > { %p2395_p6 = pmov %p2393_p8 }
  0x85   : > { %1950 = dma.done.wait (%p2394_p12), [#allocation9], 4096  }
  0x86   : > { %1952 = vsyncadd (%p2395_p6), [#allocation9], 4294963200  ;;  %v1981_v0 = vmov 0.0   ;;  %v279_v1 = vld [vmem:[#allocation5 + $0x8] sm:$0xff]  ;;  %v281_v2 = vld [vmem:[#allocation5 + $0x18] sm:$0xff]  ;;  %s2306_s21 = scalar_lea.vmem [#allocation10], %s1335_s12 }
  0x87   : > { %374 = vmatprep.mubr.f32.mxu0 %v1981_v0  ;;  %v278_v3 = vld [vmem:[#allocation5] sm:$0xff]  ;;  %v1427_v4 = vpack.c.bf16 %v281_v2, %v279_v1  ;;  %v280_v5 = vld [vmem:[#allocation5 + $0x10] sm:$0xff]  ;;  %v283_v6 = vld [vmem:[#allocation5 + $0x28] sm:$0xff]  ;;  %s1346_s23 = sshll.u32 %s2031_s19, 11  ;;  %s1223_s28 = sshll.u32 %s2306_s21, 4  ;;  %s2330_s28 = int_to_ptr.vmem [resolvable:$true] %s1223_s28 }
  0x88   : > { %v285_v7 = vld [vmem:[#allocation5 + $0x38] sm:$0xff]  ;;  %v1429_v8 = vpack.c.bf16 %v280_v5, %v278_v3  ;;  %v282_v10 = vld [vmem:[#allocation5 + $0x20] sm:$0xff]  ;;  %v284_v11 = vld [vmem:[#allocation5 + $0x30] sm:$0xff]  ;;  %s2328_s8 = scalar_lea.hbm %s2378_s4, %s1346_s23  ;;  %s1210_s14 = scalar_lea.sflag [#allocation4], %s2208_s20 }
  0x89   : > { %v1431_v9 = vpack.c.bf16 %v285_v7, %v283_v6  ;;  %v287_v12 = vld [vmem:[#allocation5 + $0x48] sm:$0xff]  ;;  %1428 = vmatprep.subr.bf16.mxu0 %v1427_v4  ;;  %v289_v13 = vld [vmem:[#allocation5 + $0x58] sm:$0xff]  ;;  %v1433_v14 = vpack.c.bf16 %v284_v11, %v282_v10  ;;  %v286_v16 = vld [vmem:[#allocation5 + $0x40] sm:$0xff]  ;;  %s1897_s30 = scalar_lea.vmem %s2330_s28, 2048  ;;  %s1982_s19 = smov [#allocation10]  }
  0x8a   : > { %1430 = vmatpush1.bf16.msra.mxu0 %v1429_v8  ;;  %v1435_v15 = vpack.c.bf16 %v289_v13, %v287_v12  ;;  %v288_v17 = vld [vmem:[#allocation5 + $0x50] sm:$0xff]  ;;  %v291_v18 = vld [vmem:[#allocation5 + $0x68] sm:$0xff]  ;;  %v293_v19 = vld [vmem:[#allocation5 + $0x78] sm:$0xff]  ;;  %p1898_p0 = scmp.ne.s32.totalorder %s2330_s28, %s1897_s30  ;;  %s1901_s29 = sshll.u32 %s1982_s19, 4  ;;  %s1902_s29 = int_to_ptr.vmem [resolvable:$false] %s1901_s29 }
  0x8b   : > { %1432 = vmatprep.subr.bf16.mxu0 %v1431_v9  ;;  %v1437_v20 = vpack.c.bf16 %v288_v17, %v286_v16  ;;  %v1439_v21 = vpack.c.bf16 %v293_v19, %v291_v18  ;;  %v290_v22 = vld [vmem:[#allocation5 + $0x60] sm:$0xff]  ;;  %v292_v23 = vld [vmem:[#allocation5 + $0x70] sm:$0xff]  ;;  %v295_v24 = vld [vmem:[#allocation5 + $0x88] sm:$0xff]  ;;  %s1903_s24 = scalar_lea.vmem %s1902_s29, 4096  ;;  %p1904_p11 = scmp.lt.s32.totalorder %s2330_s28, %s1902_s29 }
  0x8c   : > { %v297_v25 = vld [vmem:[#allocation5 + $0x98] sm:$0xff]  ;;  %v1441_v26 = vpack.c.bf16 %v292_v23, %v290_v22  ;;  %v294_v28 = vld [vmem:[#allocation5 + $0x80] sm:$0xff]  ;;  %v296_v29 = vld [vmem:[#allocation5 + $0x90] sm:$0xff]  ;;  %p1899_p3 = pnand %p1898_p0, %p2157_p5  ;;  %p1905_p2 = scmp.lt.s32.totalorder %s1903_s24, %s1897_s30 }
  0x8d   : > { %v1443_v27 = vpack.c.bf16 %v297_v25, %v295_v24  ;;  %v299_v30 = vld [vmem:[#allocation5 + $0xa8] sm:$0xff]  ;;  %v301_v31 = vld [vmem:[#allocation5 + $0xb8] sm:$0xff]  ;;  %v298_v32 = vld [vmem:[#allocation5 + $0xa0] sm:$0xff]  ;;  %v1445_v34 = vpack.c.bf16 %v296_v29, %v294_v28 }
  0x8e   : > { %1434 = vmatpush1.bf16.msra.mxu0 %v1433_v14  ;;  %v300_v33 = vld [vmem:[#allocation5 + $0xb0] sm:$0xff]  ;;  %v303_v35 = vld [vmem:[#allocation5 + $0xc8] sm:$0xff]  ;;  %v305_v36 = vld [vmem:[#allocation5 + $0xd8] sm:$0xff]  ;;  %v1447_v40 = vpack.c.bf16 %v301_v31, %v299_v30  ;;  %p1900_p7 = pneg %p1899_p3  ;;  %p1906_p1 = por %p1905_p2, %p1904_p11 }
  0x8f   : > { %1436 = vmatprep.subr.bf16.mxu0 %v1435_v15  ;;  %v472_v37 = vld [vmem:[#allocation7 + $0x8] sm:$0xff]  ;;  %v474_v38 = vld [vmem:[#allocation7 + $0x18] sm:$0xff]  ;;  %v471_v39 = vld [vmem:[#allocation7] sm:$0xff]  ;;  %v1449_v51 = vpack.c.bf16 %v300_v33, %v298_v32  ;;  %v1451_v55 = vpack.c.bf16 %v305_v36, %v303_v35 }
  0x90   : > { %v1459_v41 = vpack.c.bf16 %v474_v38, %v472_v37  ;;  %v473_v42 = vld [vmem:[#allocation7 + $0x10] sm:$0xff]  ;;  %v476_v43 = vld [vmem:[#allocation7 + $0x28] sm:$0xff]  ;;  %v478_v44 = vld [vmem:[#allocation7 + $0x38] sm:$0xff]  ;;  %p1907_p4 = pnand %p1906_p1, %p1900_p7 }
  0x91   : > { %v1461_v45 = vpack.c.bf16 %v473_v42, %v471_v39  ;;  %v1463_v46 = vpack.c.bf16 %v478_v44, %v476_v43  ;;  %v475_v47 = vld [vmem:[#allocation7 + $0x20] sm:$0xff]  ;;  %v477_v48 = vld [vmem:[#allocation7 + $0x30] sm:$0xff]  ;;  %v480_v49 = vld [vmem:[#allocation7 + $0x48] sm:$0xff] }
  0x92   : > { %1438 = vmatpush1.bf16.msra.mxu0 %v1437_v20  ;;  %1460 = vmatprep.subr.bf16.mxu1 %v1459_v41  ;;  %v482_v50 = vld [vmem:[#allocation7 + $0x58] sm:$0xff]  ;;  %v302_v52 = vld [vmem:[#allocation5 + $0xc0] sm:$0xff]  ;;  %v304_v53 = vld [vmem:[#allocation5 + $0xd0] sm:$0xff]  ;;  %v1465_v54 = vpack.c.bf16 %v477_v48, %v475_v47 }
  0x93   : > { %1440 = vmatprep.subr.bf16.mxu0 %v1439_v21  ;;  %1462 = vmatpush1.bf16.msra.mxu1 %v1461_v45  ;;  %v307_v56 = vld [vmem:[#allocation5 + $0xe8] sm:$0xff]  ;;  %v1467_v57 = vpack.c.bf16 %v482_v50, %v480_v49  ;;  %v479_v58 = vld [vmem:[#allocation7 + $0x40] sm:$0xff]  ;;  %v481_v59 = vld [vmem:[#allocation7 + $0x50] sm:$0xff]  ;;  %v1453_v63 = vpack.c.bf16 %v304_v53, %v302_v52 }
  0x94   : > { %1464 = vmatprep.subr.bf16.mxu1 %v1463_v46  ;;  %v309_v60 = vld [vmem:[#allocation5 + $0xf8] sm:$0xff]  ;;  %v484_v61 = vld [vmem:[#allocation7 + $0x68] sm:$0xff]  ;;  %v306_v1 = vld [vmem:[#allocation5 + $0xe0] sm:$0xff]  ;;  %v1469_v2 = vpack.c.bf16 %v481_v59, %v479_v58 }
  0x95   : > { %v486_v62 = vld [vmem:[#allocation7 + $0x78] sm:$0xff]  ;;  %v1455_v3 = vpack.c.bf16 %v309_v60, %v307_v56  ;;  %v308_v4 = vld [vmem:[#allocation5 + $0xf0] sm:$0xff]  ;;  %v483_v6 = vld [vmem:[#allocation7 + $0x60] sm:$0xff] }
  0x96   : > { %1442 = vmatpush1.bf16.msra.mxu0 %v1441_v26  ;;  %v1471_v5 = vpack.c.bf16 %v486_v62, %v484_v61  ;;  %v485_v7 = vld [vmem:[#allocation7 + $0x70] sm:$0xff]  ;;  %v488_v8 = vld [vmem:[#allocation7 + $0x88] sm:$0xff]  ;;  %v490_v9 = vld [vmem:[#allocation7 + $0x98] sm:$0xff]  ;;  %v1457_v10 = vpack.c.bf16 %v308_v4, %v306_v1 }
  0x97   : > { %1444 = vmatprep.subr.bf16.mxu0 %v1443_v27  ;;  %1466 = vmatpush1.bf16.msra.mxu1 %v1465_v54  ;;  %v1473_v11 = vpack.c.bf16 %v485_v7, %v483_v6  ;;  %v1475_v12 = vpack.c.bf16 %v490_v9, %v488_v8  ;;  %v487_v13 = vld [vmem:[#allocation7 + $0x80] sm:$0xff]  ;;  %v489_v14 = vld [vmem:[#allocation7 + $0x90] sm:$0xff]  ;;  %v492_v15 = vld [vmem:[#allocation7 + $0xa8] sm:$0xff] }
  0x98   : > { %1468 = vmatprep.subr.bf16.mxu1 %v1467_v57  ;;  %v494_v16 = vld [vmem:[#allocation7 + $0xb8] sm:$0xff]  ;;  %v262_v17 = vld [vmem:[%s2214_s9] sm:$0xff]  ;;  %v1477_v18 = vpack.c.bf16 %v489_v14, %v487_v13  ;;  %v493_v21 = vld [vmem:[#allocation7 + $0xb0] sm:$0xff] }
  0x99   : > { %v1479_v19 = vpack.c.bf16 %v494_v16, %v492_v15  ;;  %v491_v20 = vld [vmem:[#allocation7 + $0xa0] sm:$0xff]  ;;  %v496_v22 = vld [vmem:[#allocation7 + $0xc8] sm:$0xff]  ;;  %v498_v23 = vld [vmem:[#allocation7 + $0xd8] sm:$0xff] }
  0x9a   : > { %1446 = vmatpush1.bf16.msra.mxu0 %v1445_v34  ;;  %v263_v24 = vld [vmem:[%s2214_s9 + $0x8] sm:$0xff]  ;;  %v1481_v25 = vpack.c.bf16 %v493_v21, %v491_v20  ;;  %v1483_v26 = vpack.c.bf16 %v498_v23, %v496_v22  ;;  %v495_v27 = vld [vmem:[#allocation7 + $0xc0] sm:$0xff]  ;;  %v497_v28 = vld [vmem:[#allocation7 + $0xd0] sm:$0xff] }
  0x9b   : > { %1448 = vmatprep.subr.bf16.mxu0 %v1447_v40  ;;  %1470 = vmatpush1.bf16.msra.mxu1 %v1469_v2  ;;  %v500_v29 = vld [vmem:[#allocation7 + $0xe8] sm:$0xff]  ;;  %v502_v30 = vld [vmem:[#allocation7 + $0xf8] sm:$0xff]  ;;  %v264_v31 = vld [vmem:[%s2214_s9 + $0x10] sm:$0xff]  ;;  %v1485_v32 = vpack.c.bf16 %v497_v28, %v495_v27 }
  0x9c   : > { %1472 = vmatprep.subr.bf16.mxu1 %v1471_v5  ;;  %v1487_v33 = vpack.c.bf16 %v502_v30, %v500_v29  ;;  %v499_v34 = vld [vmem:[#allocation7 + $0xe0] sm:$0xff]  ;;  %v501_v35 = vld [vmem:[#allocation7 + $0xf0] sm:$0xff]  ;;  %v504_v36 = vld [vmem:[#allocation7 + $0x108] sm:$0xff] }
  0x9d   : > { %v506_v37 = vld [vmem:[#allocation7 + $0x118] sm:$0xff]  ;;  %v1489_v39 = vpack.c.bf16 %v501_v35, %v499_v34  ;;  %v503_v41 = vld [vmem:[#allocation7 + $0x100] sm:$0xff]  ;;  %v505_v42 = vld [vmem:[#allocation7 + $0x110] sm:$0xff] }
  0x9e   : > { %1450 = vmatpush1.bf16.msra.mxu0 %v1449_v51  ;;  %v265_v38 = vld [vmem:[%s2214_s9 + $0x18] sm:$0xff]  ;;  %v1491_v40 = vpack.c.bf16 %v506_v37, %v504_v36  ;;  %v508_v43 = vld [vmem:[#allocation7 + $0x128] sm:$0xff]  ;;  %v266_v45 = vld [vmem:[%s2214_s9 + $0x20] sm:$0xff]  ;;  %v1493_v46 = vpack.c.bf16 %v505_v42, %v503_v41 }
  0x9f   : > { %1452 = vmatprep.subr.bf16.mxu0 %v1451_v55  ;;  %1474 = vmatpush1.bf16.msra.mxu1 %v1473_v11  ;;  %v510_v44 = vld [vmem:[#allocation7 + $0x138] sm:$0xff]  ;;  %v507_v48 = vld [vmem:[#allocation7 + $0x120] sm:$0xff]  ;;  %v509_v49 = vld [vmem:[#allocation7 + $0x130] sm:$0xff] }
  0xa0   : > { %1476 = vmatprep.subr.bf16.mxu1 %v1475_v12  ;;  %v1495_v47 = vpack.c.bf16 %v510_v44, %v508_v43  ;;  %v512_v50 = vld [vmem:[#allocation7 + $0x148] sm:$0xff]  ;;  %v514_v51 = vld [vmem:[#allocation7 + $0x158] sm:$0xff]  ;;  %v1497_v53 = vpack.c.bf16 %v509_v49, %v507_v48  ;;  %v511_v55 = vld [vmem:[#allocation7 + $0x140] sm:$0xff] }
  0xa1   : > { %v267_v52 = vld [vmem:[%s2214_s9 + $0x28] sm:$0xff]  ;;  %v1499_v54 = vpack.c.bf16 %v514_v51, %v512_v50  ;;  %v513_v56 = vld [vmem:[#allocation7 + $0x150] sm:$0xff]  ;;  %v269_v59 = vld [vmem:[%s2214_s9 + $0x38] sm:$0xff] }
  0xa2   : > { %1454 = vmatpush1.bf16.msra.mxu0 %v1453_v63  ;;  %v268_v57 = vld [vmem:[%s2214_s9 + $0x30] sm:$0xff]  ;;  %v1501_v58 = vpack.c.bf16 %v513_v56, %v511_v55  ;;  %v270_v60 = vld [vmem:[%s2214_s9 + $0x40] sm:$0xff]  ;;  %v271_v61 = vld [vmem:[%s2214_s9 + $0x48] sm:$0xff] }
  0xa3   : > { %1456 = vmatprep.subr.bf16.mxu0 %v1455_v3  ;;  %1478 = vmatpush1.bf16.msra.mxu1 %v1477_v18  ;;  %v272_v62 = vld [vmem:[%s2214_s9 + $0x50] sm:$0xff]  ;;  %v273_v63 = vld [vmem:[%s2214_s9 + $0x58] sm:$0xff]  ;;  %v274_v1 = vld [vmem:[%s2214_s9 + $0x60] sm:$0xff] }
  0xa4   : > { %1480 = vmatprep.subr.bf16.mxu1 %v1479_v19  ;;  %v275_v2 = vld [vmem:[%s2214_s9 + $0x68] sm:$0xff]  ;;  %v276_v3 = vld [vmem:[%s2214_s9 + $0x70] sm:$0xff]  ;;  %v277_v4 = vld [vmem:[%s2214_s9 + $0x78] sm:$0xff] }
  0xa5   : > { %v516_v5 = vld [vmem:[#allocation7 + $0x168] sm:$0xff]  ;;  %v518_v6 = vld [vmem:[#allocation7 + $0x178] sm:$0xff]  ;;  %v515_v8 = vld [vmem:[#allocation7 + $0x160] sm:$0xff] }
  0xa6   : > { %1458 = vmatpush1.bf16.msra.mxu0 %v1457_v10  ;;  %v1503_v7 = vpack.c.bf16 %v518_v6, %v516_v5  ;;  %v517_v9 = vld [vmem:[#allocation7 + $0x170] sm:$0xff]  ;;  %v520_v11 = vld [vmem:[#allocation7 + $0x188] sm:$0xff]  ;;  %v522_v12 = vld [vmem:[#allocation7 + $0x198] sm:$0xff] }
  0xa7   : > { %1482 = vmatpush1.bf16.msra.mxu1 %v1481_v25  ;;  %v1505_v10 = vpack.c.bf16 %v517_v9, %v515_v8  ;;  %v1507_v13 = vpack.c.bf16 %v522_v12, %v520_v11  ;;  %v519_v14 = vld [vmem:[#allocation7 + $0x180] sm:$0xff]  ;;  %v521_v15 = vld [vmem:[#allocation7 + $0x190] sm:$0xff]  ;;  %v528_v22 = vld [vmem:[#allocation7 + $0x1c8] sm:$0xff] }
  0xa8   : > { %1484 = vmatprep.subr.bf16.mxu1 %v1483_v26  ;;  %v1509_v16 = vpack.c.bf16 %v521_v15, %v519_v14  ;;  %v523_v19 = vld [vmem:[#allocation7 + $0x1a0] sm:$0xff]  ;;  %v525_v20 = vld [vmem:[#allocation7 + $0x1b0] sm:$0xff]  ;;  %v530_v23 = vld [vmem:[#allocation7 + $0x1d8] sm:$0xff] }
  0xa9   : > { %375 = vmatmul.mubr.f32.vlgmr.msra.gmra.mrb[0].mxu0 %v262_v17  ;;  %v524_v17 = vld [vmem:[#allocation7 + $0x1a8] sm:$0xff]  ;;  %v1513_v21 = vpack.c.bf16 %v525_v20, %v523_v19  ;;  %v527_v25 = vld [vmem:[#allocation7 + $0x1c0] sm:$0xff]  ;;  %v529_v26 = vld [vmem:[#allocation7 + $0x1d0] sm:$0xff] }
  0xaa   : > { %380 = vmatprep.mubr.f32.mxu0 %v1981_v0  ;;  %v1517_v27 = vpack.c.bf16 %v529_v26, %v527_v25  ;;  %v532_v28 = vld [vmem:[#allocation7 + $0x1e8] sm:$0xff]  ;;  %v534_v29 = vld [vmem:[#allocation7 + $0x1f8] sm:$0xff]  ;;  %v872_v34 = vld [vmem:[#allocation8 + $0x80] sm:$0xff] }
  0xab   : > { %1486 = vmatpush1.bf16.msra.mxu1 %v1485_v32  ;;  %v1519_v30 = vpack.c.bf16 %v534_v29, %v532_v28  ;;  %v533_v32 = vld [vmem:[#allocation7 + $0x1f0] sm:$0xff]  ;;  %v873_v35 = vld [vmem:[#allocation8 + $0x88] sm:$0xff]  ;;  %v856_v36 = vld [vmem:[#allocation8] sm:$0xff] }
  0xac   : > { %1488 = vmatprep.subr.bf16.mxu1 %v1487_v33  ;;  %v1523_v37 = vpack.c.bf16 %v873_v35, %v872_v34  ;;  %v858_v43 = vld [vmem:[#allocation8 + $0x10] sm:$0xff]  ;;  %v859_v44 = vld [vmem:[#allocation8 + $0x18] sm:$0xff]  ;;  %v860_v49 = vld [vmem:[#allocation8 + $0x20] sm:$0xff] }
  0xad   : > { %381 = vmatmul.mubr.f32.gmra.mrb[2].mxu0 %v263_v24  ;;  %v1515_v24 = vpack.c.bf16 %v530_v23, %v528_v22  ;;  %v861_v50 = vld [vmem:[#allocation8 + $0x28] sm:$0xff]  ;;  %v878_v51 = vld [vmem:[#allocation8 + $0xb0] sm:$0xff]  ;;  %v863_v56 = vld [vmem:[#allocation8 + $0x38] sm:$0xff] }
  0xae   : > { %386 = vmatprep.mubr.f32.mxu0 %v1981_v0  ;;  %1524 = vmatprep.subr.bf16.mxu0 %v1523_v37  ;;  %v862_v55 = vld [vmem:[#allocation8 + $0x30] sm:$0xff] }
  0xaf   : > { %1490 = vmatpush1.bf16.msra.mxu1 %v1489_v39  ;;  %v874_v39 = vld [vmem:[#allocation8 + $0x90] sm:$0xff] }
  0xb0   : > { %1492 = vmatprep.subr.bf16.mxu1 %v1491_v40  ;;  %v875_v40 = vld [vmem:[#allocation8 + $0x98] sm:$0xff] }
  0xb1   : > { %387 = vmatmul.mubr.f32.gmra.mrb[4].mxu0 %v264_v31  ;;  %v531_v31 = vld [vmem:[#allocation7 + $0x1e0] sm:$0xff]  ;;  %v2262_v42 = vpack.c.bf16 %v875_v40, %v874_v39 }
  0xb2   : > { %392 = vmatprep.mubr.f32.mxu0 %v1981_v0  ;;  %v1521_v33 = vpack.c.bf16 %v533_v32, %v531_v31 }
  0xb3   : > { %1494 = vmatpush1.bf16.msra.mxu1 %v1493_v46  ;;  %v877_v46 = vld [vmem:[#allocation8 + $0xa8] sm:$0xff] }
  0xb4   : > { %1496 = vmatprep.subr.bf16.mxu1 %v1495_v47  ;;  %v2265_v47 = vpack.c.bf16 %v859_v44, %v858_v43 }
  0xb5   : > { %393 = vmatmul.mubr.f32.gmra.mrb[6].mxu0 %v265_v38  ;;  %v857_v38 = vld [vmem:[#allocation8 + $0x8] sm:$0xff] }
  0xb6   : > { %398 = vmatprep.mubr.f32.mxu0 %v1981_v0  ;;  %v2260_v41 = vpack.c.bf16 %v857_v38, %v856_v36 }
  0xb7   : > { %1498 = vmatpush1.bf16.msra.mxu1 %v1497_v53  ;;  %v2271_v53 = vpack.c.bf16 %v861_v50, %v860_v49 }
  0xb8   : > { %1500 = vmatprep.subr.bf16.mxu1 %v1499_v54  ;;  %1526 = vmatpush3.bf16.msra.mxu0 %v2260_v41 }
  0xb9   : > { %399 = vmatmul.mubr.f32.gmra.mrb[8].mxu0 %v266_v45  ;;  %v876_v45 = vld [vmem:[#allocation8 + $0xa0] sm:$0xff]  ;;  %1528 = vmatprep.subr.bf16.mxu0 %v2262_v42 }
  0xba   : > { %404 = vmatprep.mubr.f32.mxu0 %v1981_v0  ;;  %v2268_v48 = vpack.c.bf16 %v877_v46, %v876_v45 }
  0xbb   : > { %1502 = vmatpush1.bf16.msra.mxu1 %v1501_v58 }
  0xbc   : > { %1504 = vmatprep.subr.bf16.mxu1 %v1503_v7  ;;  %1530 = vmatpush3.bf16.msra.mxu0 %v2265_v47 }
  0xbd   : > { %405 = vmatmul.mubr.f32.gmra.mrb[10].mxu0 %v267_v52  ;;  %v879_v52 = vld [vmem:[#allocation8 + $0xb8] sm:$0xff]  ;;  %1532 = vmatprep.subr.bf16.mxu0 %v2268_v48 }
  0xbe   : > { %410 = vmatprep.mubr.f32.mxu0 %v1981_v0  ;;  %v2274_v54 = vpack.c.bf16 %v879_v52, %v878_v51 }
  0xbf   : > { %1506 = vmatpush1.bf16.msra.mxu1 %v1505_v10 }
  0xc0   : > { %1508 = vmatprep.subr.bf16.mxu1 %v1507_v13  ;;  %1534 = vmatpush3.bf16.msra.mxu0 %v2271_v53 }
  0xc1   : > { %411 = vmatmul.mubr.f32.gmra.mrb[12].mxu0 %v268_v57  ;;  %v2277_v57 = vpack.c.bf16 %v863_v56, %v862_v55  ;;  %1536 = vmatprep.subr.bf16.mxu0 %v2274_v54 }
  0xc2   : > { %416 = vmatprep.mubr.f32.mxu0 %v1981_v0 }
  0xc3   : > { %1510 = vmatpush1.bf16.msra.mxu1 %v1509_v16 }
  0xc4   : > { %1538 = vmatpush3.bf16.msra.mxu0 %v2277_v57 }
  0xc5   : > { %417 = vmatmul.mubr.f32.gmra.mrb[14].mxu0 %v269_v59 }
  0xc6   : > { %422 = vmatprep.mubr.f32.mxu0 %v1981_v0 }
  0xc9   : > { %423 = vmatmul.mubr.f32.gmra.mrb[16].mxu0 %v270_v60 }
  0xca   : > { %428 = vmatprep.mubr.f32.mxu0 %v1981_v0 }
  0xcd   : > { %429 = vmatmul.mubr.f32.gmra.mrb[18].mxu0 %v271_v61 }
  0xce   : > { %434 = vmatprep.mubr.f32.mxu0 %v1981_v0 }
  0xd1   : > { %435 = vmatmul.mubr.f32.gmra.mrb[20].mxu0 %v272_v62 }
  0xd2   : > { %440 = vmatprep.mubr.f32.mxu0 %v1981_v0 }
  0xd5   : > { %441 = vmatmul.mubr.f32.gmra.mrb[22].mxu0 %v273_v63 }
  0xd6   : > { %446 = vmatprep.mubr.f32.mxu0 %v1981_v0 }
  0xd9   : > { %447 = vmatmul.mubr.f32.gmra.mrb[24].mxu0 %v274_v1 }
  0xda   : > { %452 = vmatprep.mubr.f32.mxu0 %v1981_v0 }
  0xdd   : > { %453 = vmatmul.mubr.f32.gmra.mrb[26].mxu0 %v275_v2 }
  0xde   : > { %458 = vmatprep.mubr.f32.mxu0 %v1981_v0 }
  0xe1   : > { %459 = vmatmul.mubr.f32.gmra.mrb[28].mxu0 %v276_v3 }
  0xe2   : > { %464 = vmatprep.mubr.f32.mxu0 %v1981_v0  ;;  %v526_v0 = vld [vmem:[#allocation7 + $0x1b8] sm:$0xff] }
  0xe3   : > { %v1511_v18 = vpack.c.bf16 %v526_v0, %v524_v17 }
  0xe5   : > { %465 = vmatmul.mubr.f32.gmra.mrb[30].mxu0 %v277_v4  ;;  %1512 = vmatprep.subr.bf16.mxu1 %v1511_v18 }
  0xe6   : > { %1514 = vmatpush1.bf16.msra.mxu1 %v1513_v21 }
  0xe7   : > { %1516 = vmatprep.subr.bf16.mxu1 %v1515_v24 }
  0xea   : > { %1518 = vmatpush1.bf16.msra.mxu1 %v1517_v27 }
  0xeb   : > { %1520 = vmatprep.subr.bf16.mxu1 %v1519_v30 }
  0xee   : > { %1522 = vmatpush1.bf16.msra.mxu1 %v1521_v33 }
  0xef   : > { %1555 = vmatprep.subr.bf16.mxu1 %v1523_v37 }
 0x17c   : > { %v376_v58 = vpop.f32.mrb[0].mxu0 }
 0x17d   : > { %v567_v59 = vmul.f32 0.70710677, %v376_v58  ;;  %v378_v60 = vpop.f32.mrb[1].mxu0  ;;  %v535_v16 = vmul.f32 0.5, %v376_v58 }
 0x17e   : > { %v568_v61 = vmul.f32 0.70710677, %v378_v60  ;;  %v536_v14 = vmul.f32 0.5, %v378_v60 }
 0x17f   : > { %1655 = verf.f32 %v567_v59 }
 0x180   : > { %1657 = verf.f32 %v568_v61  ;;  %v382_v62 = vpop.f32.mrb[2].mxu0 }
 0x181   : > { %v569_v63 = vmul.f32 0.70710677, %v382_v62  ;;  %v384_v1 = vpop.f32.mrb[3].mxu0  ;;  %v537_v27 = vmul.f32 0.5, %v382_v62 }
 0x182   : > { %v570_v2 = vmul.f32 0.70710677, %v384_v1  ;;  %v538_v25 = vmul.f32 0.5, %v384_v1 }
 0x183   : > { %1659 = verf.f32 %v569_v63 }
 0x184   : > { %1661 = verf.f32 %v570_v2  ;;  %v388_v3 = vpop.f32.mrb[4].mxu0 }
 0x185   : > { %v571_v4 = vmul.f32 0.70710677, %v388_v3  ;;  %v390_v5 = vpop.f32.mrb[5].mxu0  ;;  %v539_v39 = vmul.f32 0.5, %v388_v3 }
 0x186   : > { %v572_v6 = vmul.f32 0.70710677, %v390_v5  ;;  %v540_v37 = vmul.f32 0.5, %v390_v5 }
 0x187   : > { %1663 = verf.f32 %v571_v4 }
 0x188   : > { %1665 = verf.f32 %v572_v6  ;;  %v394_v7 = vpop.f32.mrb[6].mxu0 }
 0x189   : > { %v1656_v8 = vpop.eup %1655  ;;  %v573_v9 = vmul.f32 0.70710677, %v394_v7  ;;  %v396_v10 = vpop.f32.mrb[7].mxu0  ;;  %v541_v55 = vmul.f32 0.5, %v394_v7 }
 0x18a   : > { %v1658_v11 = vpop.eup %1657  ;;  %v631_v12 = vadd.f32 1.0, %v1656_v8  ;;  %v574_v13 = vmul.f32 0.70710677, %v396_v10  ;;  %v542_v51 = vmul.f32 0.5, %v396_v10 }
 0x18b   : > { %1667 = verf.f32 %v573_v9  ;;  %v632_v15 = vadd.f32 1.0, %v1658_v11 }
 0x18c   : > { %1669 = verf.f32 %v574_v13  ;;  %v2281_v17 = vpop.f32.mrb[8].mxu0  ;;  %v663_v22 = vmul.f32 %v631_v12, %v535_v16 }
 0x18d   : > { %v1660_v0 = vpop.eup %1659  ;;  %v575_v18 = vmul.f32 0.70710677, %v2281_v17  ;;  %v402_v19 = vpop.f32.mrb[9].mxu0  ;;  %v664_v20 = vmul.f32 %v632_v15, %v536_v14  ;;  %v543_v3 = vmul.f32 0.5, %v2281_v17 }
 0x18e   : > { %v1662_v21 = vpop.eup %1661  ;;  %v633_v23 = vadd.f32 1.0, %v1660_v0  ;;  %v576_v24 = vmul.f32 0.70710677, %v402_v19  ;;  %v544_v1 = vmul.f32 0.5, %v402_v19 }
 0x18f   : > { %v634_v26 = vadd.f32 1.0, %v1662_v21  ;;  %1671 = verf.f32 %v575_v18  ;;  %759 = vmatprep.mubr.f32.mxu1 %v664_v20 }
 0x190   : > { %1673 = verf.f32 %v576_v24  ;;  %v2284_v28 = vpop.f32.mrb[10].mxu0  ;;  %760 = vmatmul.mubr.f32.vlgmr.msra.gmra.mrb[0].mxu1 %v663_v22  ;;  %v665_v34 = vmul.f32 %v633_v23, %v537_v27 }
 0x191   : > { %v1664_v29 = vpop.eup %1663  ;;  %v666_v30 = vmul.f32 %v634_v26, %v538_v25  ;;  %v577_v31 = vmul.f32 0.70710677, %v2284_v28  ;;  %v408_v32 = vpop.f32.mrb[11].mxu0  ;;  %1563 = vmatpush3.bf16.msra.mxu1 %v2260_v41  ;;  %v545_v13 = vmul.f32 0.5, %v2284_v28 }
 0x192   : > { %v1666_v33 = vpop.eup %1665  ;;  %v635_v35 = vadd.f32 1.0, %v1664_v29  ;;  %v578_v36 = vmul.f32 0.70710677, %v408_v32  ;;  %1556 = vmatprep.subr.bf16.mxu1 %v2262_v42 }
 0x193   : > { %v636_v38 = vadd.f32 1.0, %v1666_v33  ;;  %1675 = verf.f32 %v577_v31  ;;  %765 = vmatprep.mubr.f32.mxu1 %v666_v30 }
 0x194   : > { %1677 = verf.f32 %v578_v36  ;;  %v2289_v40 = vpop.f32.mrb[12].mxu0  ;;  %766 = vmatmul.mubr.f32.gmra.mrb[2].mxu1 %v665_v34  ;;  %v667_v49 = vmul.f32 %v635_v35, %v539_v39 }
 0x195   : > { %v1668_v43 = vpop.eup %1667  ;;  %v668_v44 = vmul.f32 %v636_v38, %v540_v37  ;;  %v579_v45 = vmul.f32 0.70710677, %v2289_v40  ;;  %v414_v41 = vpop.f32.mrb[13].mxu0  ;;  %1564 = vmatpush3.bf16.msra.mxu1 %v2265_v47  ;;  %v547_v23 = vmul.f32 0.5, %v2289_v40 }
 0x196   : > { %v1670_v46 = vpop.eup %1669  ;;  %v637_v50 = vadd.f32 1.0, %v1668_v43  ;;  %v580_v42 = vmul.f32 0.70710677, %v414_v41  ;;  %1557 = vmatprep.subr.bf16.mxu1 %v2268_v48  ;;  %v548_v21 = vmul.f32 0.5, %v414_v41 }
 0x197   : > { %v638_v52 = vadd.f32 1.0, %v1670_v46  ;;  %1679 = verf.f32 %v579_v45  ;;  %771 = vmatprep.mubr.f32.mxu1 %v668_v44 }
 0x198   : > { %1681 = verf.f32 %v580_v42  ;;  %v2294_v56 = vpop.f32.mrb[14].mxu0  ;;  %772 = vmatmul.mubr.f32.gmra.mrb[4].mxu1 %v667_v49  ;;  %v669_v62 = vmul.f32 %v637_v50, %v541_v55 }
 0x199   : > { %v1672_v58 = vpop.eup %1671  ;;  %v670_v59 = vmul.f32 %v638_v52, %v542_v51  ;;  %v581_v60 = vmul.f32 0.70710677, %v2294_v56  ;;  %v420_v47 = vpop.f32.mrb[15].mxu0  ;;  %1565 = vmatpush3.bf16.msra.mxu1 %v2271_v53  ;;  %v549_v35 = vmul.f32 0.5, %v2294_v56 }
 0x19a   : > { %v1674_v61 = vpop.eup %1673  ;;  %v639_v63 = vadd.f32 1.0, %v1672_v58  ;;  %v582_v48 = vmul.f32 0.70710677, %v420_v47  ;;  %1558 = vmatprep.subr.bf16.mxu1 %v2274_v54  ;;  %v546_v54 = vmul.f32 0.5, %v408_v32  ;;  %v550_v33 = vmul.f32 0.5, %v420_v47 }
 0x19b   : > { %v640_v2 = vadd.f32 1.0, %v1674_v61  ;;  %1683 = verf.f32 %v581_v60  ;;  %777 = vmatprep.mubr.f32.mxu1 %v670_v59 }
 0x19c   : > { %1685 = verf.f32 %v582_v48  ;;  %v424_v4 = vpop.f32.mrb[16].mxu0  ;;  %778 = vmatmul.mubr.f32.gmra.mrb[6].mxu1 %v669_v62  ;;  %v671_v9 = vmul.f32 %v639_v63, %v543_v3 }
 0x19d   : > { %v1676_v5 = vpop.eup %1675  ;;  %v672_v6 = vmul.f32 %v640_v2, %v544_v1  ;;  %v583_v7 = vmul.f32 0.70710677, %v424_v4  ;;  %v426_v8 = vpop.f32.mrb[17].mxu0  ;;  %1566 = vmatpush3.bf16.msra.mxu1 %v2277_v57  ;;  %v551_v50 = vmul.f32 0.5, %v424_v4 }
 0x19e   : > { %v1678_v53 = vpop.eup %1677  ;;  %v641_v10 = vadd.f32 1.0, %v1676_v5  ;;  %v584_v11 = vmul.f32 0.70710677, %v426_v8  ;;  %v552_v46 = vmul.f32 0.5, %v426_v8 }
 0x19f   : > { %v642_v12 = vadd.f32 1.0, %v1678_v53  ;;  %1687 = verf.f32 %v583_v7  ;;  %783 = vmatprep.mubr.f32.mxu1 %v672_v6 }
 0x1a0   : > { %1689 = verf.f32 %v584_v11  ;;  %v430_v14 = vpop.f32.mrb[18].mxu0  ;;  %784 = vmatmul.mubr.f32.gmra.mrb[8].mxu1 %v671_v9  ;;  %v673_v19 = vmul.f32 %v641_v10, %v545_v13 }
 0x1a1   : > { %v1680_v15 = vpop.eup %1679  ;;  %v674_v16 = vmul.f32 %v642_v12, %v546_v54  ;;  %v585_v17 = vmul.f32 0.70710677, %v430_v14  ;;  %v432_v0 = vpop.f32.mrb[19].mxu0  ;;  %v553_v63 = vmul.f32 0.5, %v430_v14 }
 0x1a2   : > { %v1682_v18 = vpop.eup %1681  ;;  %v643_v57 = vadd.f32 1.0, %v1680_v15  ;;  %v586_v20 = vmul.f32 0.70710677, %v432_v0  ;;  %v554_v61 = vmul.f32 0.5, %v432_v0 }
 0x1a3   : > { %v644_v22 = vadd.f32 1.0, %v1682_v18  ;;  %1691 = verf.f32 %v585_v17  ;;  %789 = vmatprep.mubr.f32.mxu1 %v674_v16 }
 0x1a4   : > { %1693 = verf.f32 %v586_v20  ;;  %v436_v24 = vpop.f32.mrb[20].mxu0  ;;  %790 = vmatmul.mubr.f32.gmra.mrb[10].mxu1 %v673_v19  ;;  %v675_v30 = vmul.f32 %v643_v57, %v547_v23 }
 0x1a5   : > { %v1684_v25 = vpop.eup %1683  ;;  %v676_v26 = vmul.f32 %v644_v22, %v548_v21  ;;  %v587_v27 = vmul.f32 0.70710677, %v436_v24  ;;  %v438_v28 = vpop.f32.mrb[21].mxu0  ;;  %v555_v10 = vmul.f32 0.5, %v436_v24 }
 0x1a6   : > { %v1686_v29 = vpop.eup %1685  ;;  %v645_v31 = vadd.f32 1.0, %v1684_v25  ;;  %v588_v32 = vmul.f32 0.70710677, %v438_v28  ;;  %v556_v53 = vmul.f32 0.5, %v438_v28 }
 0x1a7   : > { %v646_v34 = vadd.f32 1.0, %v1686_v29  ;;  %1695 = verf.f32 %v587_v27  ;;  %795 = vmatprep.mubr.f32.mxu1 %v676_v26 }
 0x1a8   : > { %1697 = verf.f32 %v588_v32  ;;  %v442_v36 = vpop.f32.mrb[22].mxu0  ;;  %796 = vmatmul.mubr.f32.gmra.mrb[12].mxu1 %v675_v30  ;;  %v677_v44 = vmul.f32 %v645_v31, %v549_v35 }
 0x1a9   : > { %v1688_v37 = vpop.eup %1687  ;;  %v678_v38 = vmul.f32 %v646_v34, %v550_v33  ;;  %v589_v39 = vmul.f32 0.70710677, %v442_v36  ;;  %v444_v40 = vpop.f32.mrb[23].mxu0  ;;  %v557_v57 = vmul.f32 0.5, %v442_v36 }
 0x1aa   : > { %v1690_v43 = vpop.eup %1689  ;;  %v647_v45 = vadd.f32 1.0, %v1688_v37  ;;  %v590_v41 = vmul.f32 0.70710677, %v444_v40  ;;  %v558_v18 = vmul.f32 0.5, %v444_v40 }
 0x1ab   : > { %v648_v49 = vadd.f32 1.0, %v1690_v43  ;;  %1699 = verf.f32 %v589_v39  ;;  %801 = vmatprep.mubr.f32.mxu1 %v678_v38 }
 0x1ac   : > { %1701 = verf.f32 %v590_v41  ;;  %v448_v42 = vpop.f32.mrb[24].mxu0  ;;  %802 = vmatmul.mubr.f32.gmra.mrb[14].mxu1 %v677_v44  ;;  %v679_v59 = vmul.f32 %v647_v45, %v551_v50 }
 0x1ad   : > { %v1692_v51 = vpop.eup %1691  ;;  %v680_v52 = vmul.f32 %v648_v49, %v552_v46  ;;  %v591_v55 = vmul.f32 0.70710677, %v448_v42  ;;  %v450_v56 = vpop.f32.mrb[25].mxu0  ;;  %v559_v31 = vmul.f32 0.5, %v448_v42 }
 0x1ae   : > { %v1694_v58 = vpop.eup %1693  ;;  %v649_v60 = vadd.f32 1.0, %v1692_v51  ;;  %v592_v47 = vmul.f32 0.70710677, %v450_v56  ;;  %v560_v29 = vmul.f32 0.5, %v450_v56 }
 0x1af   : > { %v650_v62 = vadd.f32 1.0, %v1694_v58  ;;  %1703 = verf.f32 %v591_v55  ;;  %807 = vmatprep.mubr.f32.mxu1 %v680_v52 }
 0x1b0   : > { %1705 = verf.f32 %v592_v47  ;;  %v454_v48 = vpop.f32.mrb[26].mxu0  ;;  %808 = vmatmul.mubr.f32.gmra.mrb[16].mxu1 %v679_v59  ;;  %v681_v6 = vmul.f32 %v649_v60, %v553_v63  ;;  %v881_v63 = vld [vmem:[#allocation8 + $0xc8] sm:$0xff] }
 0x1b1   : > { %v1696_v1 = vpop.eup %1695  ;;  %v682_v2 = vmul.f32 %v650_v62, %v554_v61  ;;  %v593_v3 = vmul.f32 0.70710677, %v454_v48  ;;  %v456_v4 = vpop.f32.mrb[27].mxu0  ;;  %v561_v39 = vmul.f32 0.5, %v454_v48  ;;  %v880_v62 = vld [vmem:[#allocation8 + $0xc0] sm:$0xff] }
 0x1b2   : > { %v1698_v5 = vpop.eup %1697  ;;  %v651_v7 = vadd.f32 1.0, %v1696_v1  ;;  %v594_v8 = vmul.f32 0.70710677, %v456_v4  ;;  %v562_v37 = vmul.f32 0.5, %v456_v4  ;;  %v1539_v48 = vpack.c.bf16 %v881_v63, %v880_v62  ;;  %v864_v1 = vld [vmem:[#allocation8 + $0x40] sm:$0xff]  ;;  %v882_v4 = vld [vmem:[#allocation8 + $0xd0] sm:$0xff] }
 0x1b3   : > { %v652_v9 = vadd.f32 1.0, %v1698_v5  ;;  %1707 = verf.f32 %v593_v3  ;;  %813 = vmatprep.mubr.f32.mxu1 %v682_v2  ;;  %v865_v2 = vld [vmem:[#allocation8 + $0x48] sm:$0xff]  ;;  %v883_v5 = vld [vmem:[#allocation8 + $0xd8] sm:$0xff] }
 0x1b4   : > { %1709 = verf.f32 %v594_v8  ;;  %v460_v11 = vpop.f32.mrb[28].mxu0  ;;  %814 = vmatmul.mubr.f32.gmra.mrb[18].mxu1 %v681_v6  ;;  %v683_v16 = vmul.f32 %v651_v7, %v555_v10  ;;  %v1541_v3 = vpack.c.bf16 %v865_v2, %v864_v1  ;;  %1540 = vmatprep.subr.bf16.mxu0 %v1539_v48  ;;  %v1543_v6 = vpack.c.bf16 %v883_v5, %v882_v4  ;;  %v866_v7 = vld [vmem:[#allocation8 + $0x50] sm:$0xff]  ;;  %v867_v8 = vld [vmem:[#allocation8 + $0x58] sm:$0xff]  ;;  %v885_v10 = vld [vmem:[#allocation8 + $0xe8] sm:$0xff] }
 0x1b5   : > { %v1700_v54 = vpop.eup %1699  ;;  %v684_v12 = vmul.f32 %v652_v9, %v556_v53  ;;  %v595_v13 = vmul.f32 0.70710677, %v460_v11  ;;  %v462_v14 = vpop.f32.mrb[29].mxu0  ;;  %v563_v50 = vmul.f32 0.5, %v460_v11  ;;  %1559 = vmatprep.subr.bf16.mxu1 %v1539_v48  ;;  %v1545_v53 = vpack.c.bf16 %v867_v8, %v866_v7  ;;  %v884_v9 = vld [vmem:[#allocation8 + $0xe0] sm:$0xff] }
 0x1b6   : > { %v1702_v15 = vpop.eup %1701  ;;  %v653_v17 = vadd.f32 1.0, %v1700_v54  ;;  %v596_v0 = vmul.f32 0.70710677, %v462_v14  ;;  %v564_v46 = vmul.f32 0.5, %v462_v14  ;;  %1542 = vmatpush3.bf16.msra.mxu0 %v1541_v3  ;;  %1567 = vmatpush3.bf16.msra.mxu1 %v1541_v3  ;;  %v1547_v11 = vpack.c.bf16 %v885_v10, %v884_v9  ;;  %v868_v54 = vld [vmem:[#allocation8 + $0x60] sm:$0xff]  ;;  %v886_v14 = vld [vmem:[#allocation8 + $0xf0] sm:$0xff] }
 0x1b7   : > { %v654_v19 = vadd.f32 1.0, %v1702_v15  ;;  %1711 = verf.f32 %v595_v13  ;;  %819 = vmatprep.mubr.f32.mxu1 %v684_v12  ;;  %1544 = vmatprep.subr.bf16.mxu0 %v1543_v6  ;;  %v869_v12 = vld [vmem:[#allocation8 + $0x68] sm:$0xff]  ;;  %v887_v15 = vld [vmem:[#allocation8 + $0xf8] sm:$0xff] }
 0x1b8   : > { %1713 = verf.f32 %v596_v0  ;;  %v466_v20 = vpop.f32.mrb[30].mxu0  ;;  %820 = vmatmul.mubr.f32.gmra.mrb[20].mxu1 %v683_v16  ;;  %v685_v26 = vmul.f32 %v653_v17, %v557_v57  ;;  %1560 = vmatprep.subr.bf16.mxu1 %v1543_v6  ;;  %v1549_v13 = vpack.c.bf16 %v869_v12, %v868_v54  ;;  %v1551_v16 = vpack.c.bf16 %v887_v15, %v886_v14  ;;  %v870_v17 = vld [vmem:[#allocation8 + $0x70] sm:$0xff]  ;;  %v871_v0 = vld [vmem:[#allocation8 + $0x78] sm:$0xff] }
 0x1b9   : > { %v1704_v21 = vpop.eup %1703  ;;  %v686_v22 = vmul.f32 %v654_v19, %v558_v18  ;;  %v597_v23 = vmul.f32 0.70710677, %v466_v20  ;;  %v468_v24 = vpop.f32.mrb[31].mxu0  ;;  %v565_v60 = vmul.f32 0.5, %v466_v20  ;;  %v1553_v18 = vpack.c.bf16 %v871_v0, %v870_v17 }
 0x1ba   : > { %v1706_v25 = vpop.eup %1705  ;;  %v655_v27 = vadd.f32 1.0, %v1704_v21  ;;  %v598_v28 = vmul.f32 0.70710677, %v468_v24  ;;  %v566_v58 = vmul.f32 0.5, %v468_v24  ;;  %1546 = vmatpush3.bf16.msra.mxu0 %v1545_v53  ;;  %1568 = vmatpush3.bf16.msra.mxu1 %v1545_v53 }
 0x1bb   : > { %v656_v30 = vadd.f32 1.0, %v1706_v25  ;;  %1715 = verf.f32 %v597_v23  ;;  %825 = vmatprep.mubr.f32.mxu1 %v686_v22  ;;  %1548 = vmatprep.subr.bf16.mxu0 %v1547_v11 }
 0x1bc   : > { %1717 = verf.f32 %v598_v28  ;;  %826 = vmatmul.mubr.f32.gmra.mrb[22].mxu1 %v685_v26  ;;  %v687_v35 = vmul.f32 %v655_v27, %v559_v31  ;;  %1561 = vmatprep.subr.bf16.mxu1 %v1547_v11 }
 0x1bd   : > { %v1708_v32 = vpop.eup %1707  ;;  %v688_v33 = vmul.f32 %v656_v30, %v560_v29 }
 0x1be   : > { %v1710_v34 = vpop.eup %1709  ;;  %v657_v36 = vadd.f32 1.0, %v1708_v32  ;;  %1550 = vmatpush3.bf16.msra.mxu0 %v1549_v13  ;;  %1569 = vmatpush3.bf16.msra.mxu1 %v1549_v13 }
 0x1bf   : > { %v658_v38 = vadd.f32 1.0, %v1710_v34  ;;  %831 = vmatprep.mubr.f32.mxu1 %v688_v33  ;;  %1552 = vmatprep.subr.bf16.mxu0 %v1551_v16 }
 0x1c0   : > { %832 = vmatmul.mubr.f32.gmra.mrb[24].mxu1 %v687_v35  ;;  %v689_v45 = vmul.f32 %v657_v36, %v561_v39  ;;  %1562 = vmatprep.subr.bf16.mxu1 %v1551_v16 }
 0x1c1   : > { %v1712_v40 = vpop.eup %1711  ;;  %v690_v43 = vmul.f32 %v658_v38, %v562_v37 }
 0x1c2   : > { %v1714_v44 = vpop.eup %1713  ;;  %v659_v41 = vadd.f32 1.0, %v1712_v40  ;;  %1554 = vmatpush3.bf16.msra.mxu0 %v1553_v18  ;;  %1570 = vmatpush3.bf16.msra.mxu1 %v1553_v18 }
 0x1c3   : > { %v660_v49 = vadd.f32 1.0, %v1714_v44  ;;  %837 = vmatprep.mubr.f32.mxu1 %v690_v43 }
 0x1c4   : > { %838 = vmatmul.mubr.f32.gmra.mrb[26].mxu1 %v689_v45  ;;  %v691_v55 = vmul.f32 %v659_v41, %v563_v50 }
 0x1c5   : > { %v1716_v42 = vpop.eup %1715  ;;  %v692_v51 = vmul.f32 %v660_v49, %v564_v46 }
 0x1c6   : > { %v1718_v52 = vpop.eup %1717  ;;  %v661_v56 = vadd.f32 1.0, %v1716_v42 }
 0x1c7   : > { %v662_v59 = vadd.f32 1.0, %v1718_v52  ;;  %843 = vmatprep.mubr.f32.mxu1 %v692_v51 }
 0x1c8   : > { %844 = vmatmul.mubr.f32.gmra.mrb[28].mxu1 %v691_v55  ;;  %v693_v61 = vmul.f32 %v661_v56, %v565_v60 }
 0x1c9   : > { %v694_v47 = vmul.f32 %v662_v59, %v566_v58 }
 0x1cb   : > { %849 = vmatprep.mubr.f32.mxu1 %v694_v47 }
 0x1cc   : > { %850 = vmatmul.mubr.f32.gmra.mrb[30].mxu1 %v693_v61 }
 0x263   : > { %v761_v19 = vpop.f32.mrb[0].mxu1 }
 0x264   : > { %v920_v57 = vmul.f32 0.70710677, %v761_v19  ;;  %v763_v20 = vpop.f32.mrb[1].mxu1  ;;  %v888_v39 = vmul.f32 0.5, %v761_v19 }
 0x265   : > { %v921_v21 = vmul.f32 0.70710677, %v763_v20  ;;  %v889_v37 = vmul.f32 0.5, %v763_v20 }
 0x266   : > { %1719 = verf.f32 %v920_v57 }
 0x267   : > { %1721 = verf.f32 %v921_v21  ;;  %v767_v22 = vpop.f32.mrb[2].mxu1 }
 0x268   : > { %v922_v23 = vmul.f32 0.70710677, %v767_v22  ;;  %v769_v24 = vpop.f32.mrb[3].mxu1  ;;  %v890_v55 = vmul.f32 0.5, %v767_v22 }
 0x269   : > { %v923_v25 = vmul.f32 0.70710677, %v769_v24  ;;  %v891_v51 = vmul.f32 0.5, %v769_v24 }
 0x26a   : > { %1723 = verf.f32 %v922_v23 }
 0x26b   : > { %1725 = verf.f32 %v923_v25  ;;  %v773_v26 = vpop.f32.mrb[4].mxu1 }
 0x26c   : > { %v924_v27 = vmul.f32 0.70710677, %v773_v26  ;;  %v775_v28 = vpop.f32.mrb[5].mxu1  ;;  %v892_v3 = vmul.f32 0.5, %v773_v26 }
 0x26d   : > { %v925_v29 = vmul.f32 0.70710677, %v775_v28  ;;  %v893_v1 = vmul.f32 0.5, %v775_v28 }
 0x26e   : > { %1727 = verf.f32 %v924_v27 }
 0x26f   : > { %1729 = verf.f32 %v925_v29  ;;  %v779_v30 = vpop.f32.mrb[6].mxu1 }
 0x270   : > { %v1720_v31 = vpop.eup %1719  ;;  %v926_v32 = vmul.f32 0.70710677, %v779_v30  ;;  %v781_v33 = vpop.f32.mrb[7].mxu1  ;;  %v894_v13 = vmul.f32 0.5, %v779_v30 }
 0x271   : > { %v1722_v34 = vpop.eup %1721  ;;  %v984_v35 = vadd.f32 1.0, %v1720_v31  ;;  %v927_v36 = vmul.f32 0.70710677, %v781_v33  ;;  %v895_v54 = vmul.f32 0.5, %v781_v33 }
 0x272   : > { %v985_v38 = vadd.f32 1.0, %v1722_v34  ;;  %1731 = verf.f32 %v926_v32 }
 0x273   : > { %1733 = verf.f32 %v927_v36  ;;  %v785_v40 = vpop.f32.mrb[8].mxu1  ;;  %v1016_v49 = vmul.f32 %v984_v35, %v888_v39 }
 0x274   : > { %v1724_v43 = vpop.eup %1723  ;;  %v1017_v44 = vmul.f32 %v985_v38, %v889_v37  ;;  %v928_v45 = vmul.f32 0.70710677, %v785_v40  ;;  %v787_v41 = vpop.f32.mrb[9].mxu1  ;;  %v896_v23 = vmul.f32 0.5, %v785_v40 }
 0x275   : > { %v1726_v46 = vpop.eup %1725  ;;  %v986_v50 = vadd.f32 1.0, %v1724_v43  ;;  %v929_v42 = vmul.f32 0.70710677, %v787_v41  ;;  %v897_v21 = vmul.f32 0.5, %v787_v41 }
 0x276   : > { %v987_v52 = vadd.f32 1.0, %v1726_v46  ;;  %1735 = verf.f32 %v928_v45  ;;  %1112 = vmatprep.mubr.f32.mxu0 %v1017_v44 }
 0x277   : > { %1737 = verf.f32 %v929_v42  ;;  %v791_v56 = vpop.f32.mrb[10].mxu1  ;;  %1113 = vmatmul.mubr.f32.vlgmr.msra.gmra.mrb[32].mxu0 %v1016_v49  ;;  %v1018_v62 = vmul.f32 %v986_v50, %v890_v55 }
 0x278   : > { %v1728_v58 = vpop.eup %1727  ;;  %v1019_v59 = vmul.f32 %v987_v52, %v891_v51  ;;  %v930_v60 = vmul.f32 0.70710677, %v791_v56  ;;  %v793_v47 = vpop.f32.mrb[11].mxu1  ;;  %v898_v35 = vmul.f32 0.5, %v791_v56 }
 0x279   : > { %v1730_v61 = vpop.eup %1729  ;;  %v988_v63 = vadd.f32 1.0, %v1728_v58  ;;  %v931_v48 = vmul.f32 0.70710677, %v793_v47  ;;  %v899_v33 = vmul.f32 0.5, %v793_v47 }
 0x27a   : > { %v989_v2 = vadd.f32 1.0, %v1730_v61  ;;  %1739 = verf.f32 %v930_v60  ;;  %1117 = vmatprep.mubr.f32.mxu0 %v1019_v59 }
 0x27b   : > { %1741 = verf.f32 %v931_v48  ;;  %v797_v4 = vpop.f32.mrb[12].mxu1  ;;  %1118 = vmatmul.mubr.f32.gmra.mrb[34].mxu0 %v1018_v62  ;;  %v1020_v9 = vmul.f32 %v988_v63, %v892_v3 }
 0x27c   : > { %v1732_v5 = vpop.eup %1731  ;;  %v1021_v6 = vmul.f32 %v989_v2, %v893_v1  ;;  %v932_v7 = vmul.f32 0.70710677, %v797_v4  ;;  %v799_v8 = vpop.f32.mrb[13].mxu1  ;;  %v900_v50 = vmul.f32 0.5, %v797_v4 }
 0x27d   : > { %v1734_v53 = vpop.eup %1733  ;;  %v990_v10 = vadd.f32 1.0, %v1732_v5  ;;  %v933_v11 = vmul.f32 0.70710677, %v799_v8  ;;  %v901_v46 = vmul.f32 0.5, %v799_v8 }
 0x27e   : > { %v991_v12 = vadd.f32 1.0, %v1734_v53  ;;  %1743 = verf.f32 %v932_v7  ;;  %1122 = vmatprep.mubr.f32.mxu0 %v1021_v6 }
 0x27f   : > { %1745 = verf.f32 %v933_v11  ;;  %v803_v14 = vpop.f32.mrb[14].mxu1  ;;  %1123 = vmatmul.mubr.f32.gmra.mrb[36].mxu0 %v1020_v9  ;;  %v1022_v19 = vmul.f32 %v990_v10, %v894_v13 }
 0x280   : > { %v1736_v15 = vpop.eup %1735  ;;  %v1023_v16 = vmul.f32 %v991_v12, %v895_v54  ;;  %v934_v17 = vmul.f32 0.70710677, %v803_v14  ;;  %v805_v0 = vpop.f32.mrb[15].mxu1  ;;  %v902_v63 = vmul.f32 0.5, %v803_v14 }
 0x281   : > { %v1738_v18 = vpop.eup %1737  ;;  %v992_v57 = vadd.f32 1.0, %v1736_v15  ;;  %v935_v20 = vmul.f32 0.70710677, %v805_v0  ;;  %v903_v61 = vmul.f32 0.5, %v805_v0 }
 0x282   : > { %v993_v22 = vadd.f32 1.0, %v1738_v18  ;;  %1747 = verf.f32 %v934_v17  ;;  %1127 = vmatprep.mubr.f32.mxu0 %v1023_v16 }
 0x283   : > { %1749 = verf.f32 %v935_v20  ;;  %v809_v24 = vpop.f32.mrb[16].mxu1  ;;  %1128 = vmatmul.mubr.f32.gmra.mrb[38].mxu0 %v1022_v19  ;;  %v1024_v30 = vmul.f32 %v992_v57, %v896_v23 }
 0x284   : > { %v1740_v25 = vpop.eup %1739  ;;  %v1025_v26 = vmul.f32 %v993_v22, %v897_v21  ;;  %v936_v27 = vmul.f32 0.70710677, %v809_v24  ;;  %v811_v28 = vpop.f32.mrb[17].mxu1  ;;  %v904_v10 = vmul.f32 0.5, %v809_v24 }
 0x285   : > { %v1742_v29 = vpop.eup %1741  ;;  %v994_v31 = vadd.f32 1.0, %v1740_v25  ;;  %v937_v32 = vmul.f32 0.70710677, %v811_v28  ;;  %v905_v53 = vmul.f32 0.5, %v811_v28 }
 0x286   : > { %v995_v34 = vadd.f32 1.0, %v1742_v29  ;;  %1751 = verf.f32 %v936_v27  ;;  %1132 = vmatprep.mubr.f32.mxu0 %v1025_v26 }
 0x287   : > { %1753 = verf.f32 %v937_v32  ;;  %v815_v36 = vpop.f32.mrb[18].mxu1  ;;  %1133 = vmatmul.mubr.f32.gmra.mrb[40].mxu0 %v1024_v30  ;;  %v1026_v44 = vmul.f32 %v994_v31, %v898_v35 }
 0x288   : > { %v1744_v37 = vpop.eup %1743  ;;  %v1027_v38 = vmul.f32 %v995_v34, %v899_v33  ;;  %v938_v39 = vmul.f32 0.70710677, %v815_v36  ;;  %v817_v40 = vpop.f32.mrb[19].mxu1  ;;  %v906_v57 = vmul.f32 0.5, %v815_v36 }
 0x289   : > { %v1746_v43 = vpop.eup %1745  ;;  %v996_v45 = vadd.f32 1.0, %v1744_v37  ;;  %v939_v41 = vmul.f32 0.70710677, %v817_v40  ;;  %v907_v18 = vmul.f32 0.5, %v817_v40 }
 0x28a   : > { %v997_v49 = vadd.f32 1.0, %v1746_v43  ;;  %1755 = verf.f32 %v938_v39  ;;  %1137 = vmatprep.mubr.f32.mxu0 %v1027_v38 }
 0x28b   : > { %1757 = verf.f32 %v939_v41  ;;  %v821_v42 = vpop.f32.mrb[20].mxu1  ;;  %1138 = vmatmul.mubr.f32.gmra.mrb[42].mxu0 %v1026_v44  ;;  %v1028_v59 = vmul.f32 %v996_v45, %v900_v50 }
 0x28c   : > { %v1748_v51 = vpop.eup %1747  ;;  %v1029_v52 = vmul.f32 %v997_v49, %v901_v46  ;;  %v940_v55 = vmul.f32 0.70710677, %v821_v42  ;;  %v823_v56 = vpop.f32.mrb[21].mxu1  ;;  %v908_v31 = vmul.f32 0.5, %v821_v42 }
 0x28d   : > { %v1750_v58 = vpop.eup %1749  ;;  %v998_v60 = vadd.f32 1.0, %v1748_v51  ;;  %v941_v47 = vmul.f32 0.70710677, %v823_v56  ;;  %v909_v29 = vmul.f32 0.5, %v823_v56 }
 0x28e   : > { %v999_v62 = vadd.f32 1.0, %v1750_v58  ;;  %1759 = verf.f32 %v940_v55  ;;  %1142 = vmatprep.mubr.f32.mxu0 %v1029_v52 }
 0x28f   : > { %1761 = verf.f32 %v941_v47  ;;  %v827_v48 = vpop.f32.mrb[22].mxu1  ;;  %1143 = vmatmul.mubr.f32.gmra.mrb[44].mxu0 %v1028_v59  ;;  %v1030_v6 = vmul.f32 %v998_v60, %v902_v63 }
 0x290   : > { %v1752_v1 = vpop.eup %1751  ;;  %v1031_v2 = vmul.f32 %v999_v62, %v903_v61  ;;  %v942_v3 = vmul.f32 0.70710677, %v827_v48  ;;  %v829_v4 = vpop.f32.mrb[23].mxu1  ;;  %v910_v45 = vmul.f32 0.5, %v827_v48 }
 0x291   : > { %v1754_v5 = vpop.eup %1753  ;;  %v1000_v7 = vadd.f32 1.0, %v1752_v1  ;;  %v943_v8 = vmul.f32 0.70710677, %v829_v4  ;;  %v911_v43 = vmul.f32 0.5, %v829_v4 }
 0x292   : > { %v1001_v9 = vadd.f32 1.0, %v1754_v5  ;;  %1763 = verf.f32 %v942_v3  ;;  %1147 = vmatprep.mubr.f32.mxu0 %v1031_v2 }
 0x293   : > { %1765 = verf.f32 %v943_v8  ;;  %v833_v11 = vpop.f32.mrb[24].mxu1  ;;  %1148 = vmatmul.mubr.f32.gmra.mrb[46].mxu0 %v1030_v6  ;;  %v1032_v16 = vmul.f32 %v1000_v7, %v904_v10 }
 0x294   : > { %v1756_v54 = vpop.eup %1755  ;;  %v1033_v12 = vmul.f32 %v1001_v9, %v905_v53  ;;  %v944_v13 = vmul.f32 0.70710677, %v833_v11  ;;  %v835_v14 = vpop.f32.mrb[25].mxu1  ;;  %v912_v60 = vmul.f32 0.5, %v833_v11 }
 0x295   : > { %v1758_v15 = vpop.eup %1757  ;;  %v1002_v17 = vadd.f32 1.0, %v1756_v54  ;;  %v945_v0 = vmul.f32 0.70710677, %v835_v14  ;;  %v913_v58 = vmul.f32 0.5, %v835_v14 }
 0x296   : > { %v1003_v19 = vadd.f32 1.0, %v1758_v15  ;;  %1767 = verf.f32 %v944_v13  ;;  %1152 = vmatprep.mubr.f32.mxu0 %v1033_v12 }
 0x297   : > { %1769 = verf.f32 %v945_v0  ;;  %v839_v20 = vpop.f32.mrb[26].mxu1  ;;  %1153 = vmatmul.mubr.f32.gmra.mrb[48].mxu0 %v1032_v16  ;;  %v1034_v26 = vmul.f32 %v1002_v17, %v906_v57 }
 0x298   : > { %v1760_v21 = vpop.eup %1759  ;;  %v1035_v22 = vmul.f32 %v1003_v19, %v907_v18  ;;  %v946_v23 = vmul.f32 0.70710677, %v839_v20  ;;  %v841_v24 = vpop.f32.mrb[27].mxu1  ;;  %v914_v3 = vmul.f32 0.5, %v839_v20 }
 0x299   : > { %v1762_v25 = vpop.eup %1761  ;;  %v1004_v27 = vadd.f32 1.0, %v1760_v21  ;;  %v947_v28 = vmul.f32 0.70710677, %v841_v24  ;;  %v915_v1 = vmul.f32 0.5, %v841_v24 }
 0x29a   : > { %v1005_v30 = vadd.f32 1.0, %v1762_v25  ;;  %1771 = verf.f32 %v946_v23  ;;  %1157 = vmatprep.mubr.f32.mxu0 %v1035_v22 }
 0x29b   : > { %1773 = verf.f32 %v947_v28  ;;  %v845_v32 = vpop.f32.mrb[28].mxu1  ;;  %1158 = vmatmul.mubr.f32.gmra.mrb[50].mxu0 %v1034_v26  ;;  %v1036_v38 = vmul.f32 %v1004_v27, %v908_v31 }
 0x29c   : > { %v1764_v33 = vpop.eup %1763  ;;  %v1037_v34 = vmul.f32 %v1005_v30, %v909_v29  ;;  %v948_v35 = vmul.f32 0.70710677, %v845_v32  ;;  %v847_v36 = vpop.f32.mrb[29].mxu1  ;;  %v916_v10 = vmul.f32 0.5, %v845_v32 }
 0x29d   : > { %v1766_v37 = vpop.eup %1765  ;;  %v1006_v39 = vadd.f32 1.0, %v1764_v33  ;;  %v949_v40 = vmul.f32 0.70710677, %v847_v36  ;;  %v917_v53 = vmul.f32 0.5, %v847_v36 }
 0x29e   : > { %v1007_v44 = vadd.f32 1.0, %v1766_v37  ;;  %1775 = verf.f32 %v948_v35  ;;  %1162 = vmatprep.mubr.f32.mxu0 %v1037_v34 }
 0x29f   : > { %1777 = verf.f32 %v949_v40  ;;  %v851_v41 = vpop.f32.mrb[30].mxu1  ;;  %1163 = vmatmul.mubr.f32.gmra.mrb[52].mxu0 %v1036_v38  ;;  %v1038_v52 = vmul.f32 %v1006_v39, %v910_v45 }
 0x2a0   : > { %v1768_v46 = vpop.eup %1767  ;;  %v1039_v49 = vmul.f32 %v1007_v44, %v911_v43  ;;  %v950_v50 = vmul.f32 0.70710677, %v851_v41  ;;  %v853_v42 = vpop.f32.mrb[31].mxu1  ;;  %v918_v17 = vmul.f32 0.5, %v851_v41 }
 0x2a1   : > { %v1770_v51 = vpop.eup %1769  ;;  %v1008_v55 = vadd.f32 1.0, %v1768_v46  ;;  %v951_v56 = vmul.f32 0.70710677, %v853_v42  ;;  %v919_v15 = vmul.f32 0.5, %v853_v42 }
 0x2a2   : > { %v1009_v59 = vadd.f32 1.0, %v1770_v51  ;;  %1779 = verf.f32 %v950_v50  ;;  %1167 = vmatprep.mubr.f32.mxu0 %v1039_v49 }
 0x2a3   : > { %1781 = verf.f32 %v951_v56  ;;  %1168 = vmatmul.mubr.f32.gmra.mrb[54].mxu0 %v1038_v52  ;;  %v1040_v63 = vmul.f32 %v1008_v55, %v912_v60 }
 0x2a4   : > { %v1772_v47 = vpop.eup %1771  ;;  %v1041_v61 = vmul.f32 %v1009_v59, %v913_v58 }
 0x2a5   : > { %v1774_v62 = vpop.eup %1773  ;;  %v1010_v48 = vadd.f32 1.0, %v1772_v47 }
 0x2a6   : > { %v1011_v2 = vadd.f32 1.0, %v1774_v62  ;;  %1172 = vmatprep.mubr.f32.mxu1 %v1041_v61 }
 0x2a7   : > { %1173 = vmatmul.mubr.f32.vlgmr.msra.gmra.mrb[32].mxu1 %v1040_v63  ;;  %v1042_v7 = vmul.f32 %v1010_v48, %v914_v3 }
 0x2a8   : > { %v1776_v4 = vpop.eup %1775  ;;  %v1043_v5 = vmul.f32 %v1011_v2, %v915_v1 }
 0x2a9   : > { %v1778_v6 = vpop.eup %1777  ;;  %v1012_v8 = vadd.f32 1.0, %v1776_v4 }
 0x2aa   : > { %v1013_v9 = vadd.f32 1.0, %v1778_v6  ;;  %1177 = vmatprep.mubr.f32.mxu1 %v1043_v5 }
 0x2ab   : > { %1178 = vmatmul.mubr.f32.gmra.mrb[34].mxu1 %v1042_v7  ;;  %v1044_v13 = vmul.f32 %v1012_v8, %v916_v10 }
 0x2ac   : > { %v1780_v11 = vpop.eup %1779  ;;  %v1045_v54 = vmul.f32 %v1013_v9, %v917_v53 }
 0x2ad   : > { %v1782_v12 = vpop.eup %1781  ;;  %v1014_v14 = vadd.f32 1.0, %v1780_v11 }
 0x2ae   : > { %v1015_v16 = vadd.f32 1.0, %v1782_v12  ;;  %1182 = vmatprep.mubr.f32.mxu1 %v1045_v54 }
 0x2af   : > { %1183 = vmatmul.mubr.f32.gmra.mrb[36].mxu1 %v1044_v13  ;;  %v1046_v18 = vmul.f32 %v1014_v14, %v918_v17 }
 0x2b0   : > { %v1047_v0 = vmul.f32 %v1015_v16, %v919_v15 }
 0x2b2   : > { %1187 = vmatprep.mubr.f32.mxu1 %v1047_v0 }
 0x2b3   : > { %1188 = vmatmul.mubr.f32.gmra.mrb[38].mxu1 %v1046_v18 }
 0x34a   : > { %v1379_v19 = vpop.f32.mrb[32].mxu0 }
 0x34b   : > { %v1380_v57 = vpop.f32.mrb[33].mxu0 }
 0x34c   : > { %v1381_v20 = vadd.f32 %v1380_v57, %v1379_v19 }
 0x34e   : > { %1193 = vst [vmem:[%s2306_s21] sm:$0xff] %v1381_v20  ;;  %v1382_v21 = vpop.f32.mrb[34].mxu0 }
 0x34f   : > { %v1383_v22 = vpop.f32.mrb[35].mxu0 }
 0x350   : > { %v1384_v23 = vadd.f32 %v1383_v22, %v1382_v21 }
 0x352   : > { %1194 = vst [vmem:[%s2306_s21 + $0x8] sm:$0xff] %v1384_v23  ;;  %v1385_v24 = vpop.f32.mrb[36].mxu0 }
 0x353   : > { %v1386_v25 = vpop.f32.mrb[37].mxu0 }
 0x354   : > { %v1387_v26 = vadd.f32 %v1386_v25, %v1385_v24 }
 0x356   : > { %1195 = vst [vmem:[%s2306_s21 + $0x10] sm:$0xff] %v1387_v26  ;;  %v1388_v27 = vpop.f32.mrb[38].mxu0 }
 0x357   : > { %v1389_v28 = vpop.f32.mrb[39].mxu0 }
 0x358   : > { %v1390_v29 = vadd.f32 %v1389_v28, %v1388_v27 }
 0x35a   : > { %1196 = vst [vmem:[%s2306_s21 + $0x18] sm:$0xff] %v1390_v29  ;;  %v1391_v30 = vpop.f32.mrb[40].mxu0 }
 0x35b   : > { %v1392_v31 = vpop.f32.mrb[41].mxu0 }
 0x35c   : > { %v1393_v32 = vadd.f32 %v1392_v31, %v1391_v30 }
 0x35e   : > { %1197 = vst [vmem:[%s2306_s21 + $0x20] sm:$0xff] %v1393_v32  ;;  %v1394_v33 = vpop.f32.mrb[42].mxu0 }
 0x35f   : > { %v1395_v34 = vpop.f32.mrb[43].mxu0 }
 0x360   : > { %v1396_v35 = vadd.f32 %v1395_v34, %v1394_v33 }
 0x362   : > { %1198 = vst [vmem:[%s2306_s21 + $0x28] sm:$0xff] %v1396_v35  ;;  %v1397_v36 = vpop.f32.mrb[44].mxu0 }
 0x363   : > { %v1398_v37 = vpop.f32.mrb[45].mxu0 }
 0x364   : > { %v1399_v38 = vadd.f32 %v1398_v37, %v1397_v36 }
 0x366   : > { %1199 = vst [vmem:[%s2306_s21 + $0x30] sm:$0xff] %v1399_v38  ;;  %v1400_v39 = vpop.f32.mrb[46].mxu0 }
 0x367   : > { %v1401_v40 = vpop.f32.mrb[47].mxu0 }
 0x368   : > { %v1402_v43 = vadd.f32 %v1401_v40, %v1400_v39 }
 0x36a   : > { %1200 = vst [vmem:[%s2306_s21 + $0x38] sm:$0xff] %v1402_v43  ;;  %v1403_v44 = vpop.f32.mrb[48].mxu0 }
 0x36b   : > { %v1404_v45 = vpop.f32.mrb[49].mxu0 }
 0x36c   : > { %v1405_v41 = vadd.f32 %v1404_v45, %v1403_v44 }
 0x36e   : > { %1201 = vst [vmem:[%s2306_s21 + $0x40] sm:$0xff] %v1405_v41  ;;  %v1406_v46 = vpop.f32.mrb[50].mxu0 }
 0x36f   : > { %v1407_v49 = vpop.f32.mrb[51].mxu0 }
 0x370   : > { %v1408_v50 = vadd.f32 %v1407_v49, %v1406_v46 }
 0x372   : > { %1202 = vst [vmem:[%s2306_s21 + $0x48] sm:$0xff] %v1408_v50  ;;  %v1409_v42 = vpop.f32.mrb[52].mxu0 }
 0x373   : > { %v1410_v51 = vpop.f32.mrb[53].mxu0 }
 0x374   : > { %v1411_v52 = vadd.f32 %v1410_v51, %v1409_v42 }
 0x376   : > { %1203 = vst [vmem:[%s2306_s21 + $0x50] sm:$0xff] %v1411_v52  ;;  %v1412_v55 = vpop.f32.mrb[54].mxu0 }
 0x377   : > { %v1413_v56 = vpop.f32.mrb[55].mxu0 }
 0x378   : > { %v1414_v58 = vadd.f32 %v1413_v56, %v1412_v55 }
 0x37a   : > { %1204 = vst [vmem:[%s2306_s21 + $0x58] sm:$0xff] %v1414_v58  ;;  %v1415_v59 = vpop.f32.mrb[32].mxu1 }
 0x37b   : > { %v1416_v60 = vpop.f32.mrb[33].mxu1 }
 0x37c   : > { %v1417_v47 = vadd.f32 %v1416_v60, %v1415_v59 }
 0x37e   : > { %1205 = vst [vmem:[%s2306_s21 + $0x60] sm:$0xff] %v1417_v47  ;;  %v1418_v61 = vpop.f32.mrb[34].mxu1 }
 0x37f   : > { %v1419_v62 = vpop.f32.mrb[35].mxu1 }
 0x380   : > { %v1420_v63 = vadd.f32 %v1419_v62, %v1418_v61 }
 0x382   : > { %1206 = vst [vmem:[%s2306_s21 + $0x68] sm:$0xff] %v1420_v63  ;;  %v1421_v48 = vpop.f32.mrb[36].mxu1 }
 0x383   : > { %v1422_v1 = vpop.f32.mrb[37].mxu1 }
 0x384   : > { %v1423_v2 = vadd.f32 %v1422_v1, %v1421_v48 }
 0x386   : > { %1207 = vst [vmem:[%s2306_s21 + $0x70] sm:$0xff] %v1423_v2  ;;  %v1424_v3 = vpop.f32.mrb[38].mxu1 }
 0x387   : > { %v1425_v4 = vpop.f32.mrb[39].mxu1 }
 0x388   : > { %v1426_v5 = vadd.f32 %v1425_v4, %v1424_v3 }
 0x38a   : > { %1208 = vst [vmem:[%s2306_s21 + $0x78] sm:$0xff] %v1426_v5 }
 0x38b   : > { %1910 = shalt.err (!%p1907_p4)
}
 0x38c   : > { %s1911_s5 = scalar_lea.hbm %s2328_s8, 2048  ;;  %s1915_s12 = scalar_lea.hbm %s2378_s4, 8192 }
 0x38d   : > { %p1912_p9 = scmp.ne.s32.totalorder %s2328_s8, %s1911_s5  ;;  %p1916_p8 = scmp.lt.u32.totalorder %s2328_s8, %s2378_s4 }
 0x38e   : > { %p1917_p12 = scmp.lt.u32.totalorder %s1915_s12, %s1911_s5  ;;  %p1919_p0 = scmp.lt.u32.totalorder %s1911_s5, %s2328_s8 }
 0x38f   : > { %p1913_p13 = pnand %p1912_p9, %p2157_p5 }
 0x390   : > { %p1918_p6 = por %p1917_p12, %p1916_p8 }
 0x391   : > { %p1914_p10 = pneg %p1913_p13 }
 0x392   : > { %p1920_p3 = por %p1919_p0, %p1918_p6 }
 0x394   : > { %p1921_p7 = pnand %p1920_p3, %p1914_p10 }
 0x396   : > { %1924 = shalt.err (!%p1921_p7)
}
 0x397   : > { %s1983_s21 = smov 128   ;;  %s1984_s23 = smov 8  }
 0x398   : > { %1585 = dma.vmem_to_hbm [thread:$0]  (%p2157_p5), %s2330_s28, 2048, %s2328_s8, %s1210_s14, %s1983_s21, %s1983_s21, %s1984_s23  }
 0x399 PF: > { %p1612_p11 = scmp.ge.s32.totalorder %s1971_s18, 2  ;;  %s1238_s10 = sand.u32 1, %s1959_s15  }
 0x39a   : > { %p2396_p2 = scmp.ne.s32.totalorder %s2383_s22, 0  ;;  %s1239_s6 = scalar_lea.sflag [#allocation4], %s1238_s10 }
 0x39c   : > { %p1602_p1 = pnand %p1612_p11, %p2396_p2 }
 0x39e   : > { %1954 = dma.done.wait (!%p1602_p1), %s1239_s6, 2048  }
 0x39f   : > { %1956 = vsyncadd (!%p1602_p1), %s1239_s6, 4294965248  ;;  %p19_p4 = scmp.ge.s32.totalorder %s2143_s11, 6   ;;  %s2397_s15 = smov %s1963_s16 }
 0x3a0   : > { %s2398_s16 = smov %s1967_s17  ;;  %s2399_s17 = smov %s2153_s13 }
 0x3a1   : > { %s2400_s18 = smov %s2143_s11  ;;  %21 = sbr.rel (!%p19_p4) target bundleno = 7 (0x7), region = 93 }
 0x3a8   :  { %1244 = vsyncpa [#allocation3], 1 }
 0x3a9   :  { %1246 = vsyncpa [#allocation3 + $0x1], 1 }
 0x3aa   :  { %1247 = vsyncpa [#allocation6], 1 }
 0x3ab   :  { %1248 = vsyncpa [#allocation9], 1 }
 0x3ac   :  { %1249 = vsyncpa [#allocation4], 1 }
 0x3ad   :  { %1251 = vsyncpa [#allocation4 + $0x1], 1 }

</bundles_post_ra>
